<compile_context>
chip_gen: v6e
topology: v6e:2x2x1
jax: 0.10.0
libtpu: 0.0.40
codegen_flags: <defaults>
</compile_context>

<pallas_src>
import functools

import jax
import jax.numpy as jnp
from jax import lax
from jax.experimental import pallas as pl
from jax.experimental.pallas import tpu as pltpu


# ---------------------------------------------------------------------------
# VMEM budgeting helpers
# ---------------------------------------------------------------------------
@functools.lru_cache(maxsize=1)
def _vmem_limit_bytes():
    """3/4 of chip VMEM capacity (v5e/v6e: 128 MiB, v7x: 64 MiB); 48 MiB fallback."""
    try:
        info = pltpu.get_tpu_info()
        cap = getattr(info, "vmem_capacity_bytes", None)
        if cap:
            return int(cap) * 3 // 4
    except Exception:
        pass
    return 48 * 1024 * 1024


def _choose_time_chunk(time_chunk, t_total, b_pad, d_in, h_dim, o_dim,
                       num_layers, compute_dtype, vmem_budget):
    """Largest tc <= time_chunk whose estimated per-chunk VMEM footprint fits the budget."""
    cbytes = jnp.dtype(compute_dtype).itemsize
    w_bytes = 0
    for l in range(num_layers):
        din_l = d_in if l == 0 else h_dim
        w_bytes += (din_l * h_dim + h_dim * h_dim) * cbytes + h_dim * 4
    w_bytes += h_dim * o_dim * cbytes + o_dim * 4
    state_bytes = num_layers * b_pad * h_dim * 4 + b_pad * o_dim * 4
    tc = max(1, min(time_chunk, t_total))
    while tc > 8:
        tcb = tc * b_pad
        dyn = 2 * tcb * d_in * cbytes        # x chunk, double-buffered by the pipeline
        dyn += tcb * h_dim * 4               # hoisted x-projection scratch (f32)
        dyn += tcb * h_dim * cbytes          # inter-layer hidden-sequence scratch
        if w_bytes + state_bytes + dyn <= vmem_budget:
            break
        tc //= 2
    return tc


# ---------------------------------------------------------------------------
# Fused kernel: all RNN layers + fc head, one time chunk per grid step
# ---------------------------------------------------------------------------
def _fused_rnn_fc_kernel(num_layers, tc, b_pad, tail, *refs):
    """refs layout (pallas_call order):
      x_ref                              (tc*b_pad, D)     current time chunk (squeezed)
      [w_ih_t, w_hh_t, b] * num_layers   resident weights  (constant index_map)
      w_fc_t, b_fc                       resident fc weights
      out_ref                            (b_pad, O)        resident output block
      h_0 .. h_{L-1}                     (b_pad, H) f32    carried hidden states
      xz_ref                             (tc*b_pad, H) f32 hoisted input projection
      seq_ref                            (tc*b_pad, H)     inter-layer hidden sequence
    """
    it = iter(refs)
    x_ref = next(it)
    layer_w = [(next(it), next(it), next(it)) for _ in range(num_layers)]
    w_fc_ref, b_fc_ref = next(it), next(it)
    out_ref = next(it)
    h_refs = [next(it) for _ in range(num_layers)]
    xz_ref, seq_ref = next(it), next(it)

    c = pl.program_id(0)
    last = pl.num_programs(0) - 1

    @pl.when(c == 0)
    def _():
        for h_ref in h_refs:
            h_ref[...] = jnp.zeros_like(h_ref)     # h0 == 0, as in the PyTorch module
        out_ref[...] = jnp.zeros_like(out_ref)     # robust init of the resident output

    def run_chunk(n_steps):
        """Run n_steps timesteps of every layer for the current chunk."""
        for l, (w_ih_ref, w_hh_ref, b_ref) in enumerate(layer_w):
            src_ref = x_ref if l == 0 else seq_ref
            # Hoisted input projection: one big MXU GEMM per (chunk, layer) instead of a
            # tiny matmul inside the serial loop. Reads seq_ref fully, so the loop below
            # may safely overwrite seq_ref with this layer's outputs.
            xz_ref[...] = (
                jnp.dot(src_ref[...], w_ih_ref[...],
                        preferred_element_type=jnp.float32)
                + b_ref[...]
            )
            h_ref = h_refs[l]
            write_seq = l < num_layers - 1        # last layer: only h_last is consumed

            def step(t, carry):
                row = pl.multiple_of(t * b_pad, b_pad)           # sublane-aligned offset
                h_new = jnp.tanh(
                    xz_ref[pl.ds(row, b_pad), :]
                    + jnp.dot(h_ref[...].astype(w_hh_ref.dtype), w_hh_ref[...],
                              preferred_element_type=jnp.float32)
                )
                h_ref[...] = h_new
                if write_seq:
                    seq_ref[pl.ds(row, b_pad), :] = h_new.astype(seq_ref.dtype)
                return carry

            # Partial unroll (review item): gives the scheduler visibility to overlap
            # W_hh loads / MXU / tanh / stores across adjacent steps without the vreg
            # blow-up of fully unrolling a 128-step chunk.
            lax.fori_loop(0, n_steps, step, 0, unroll=min(8, n_steps))

    if tail == 0:
        run_chunk(tc)                     # every chunk full: nothing extra on the h->h chain
    else:
        @pl.when(c != last)
        def _():
            run_chunk(tc)

        @pl.when(c == last)
        def _():
            # Only the valid steps run; h freezes at the last valid timestep, which is
            # exactly out[:, -1, :]. Padded rows of xz/seq are never read by any layer.
            run_chunk(tail)

    @pl.when(c == last)
    def _():
        out_ref[...] = (
            jnp.dot(h_refs[-1][...].astype(w_fc_ref.dtype), w_fc_ref[...],
                    preferred_element_type=jnp.float32)
            + b_fc_ref[...]
        ).astype(out_ref.dtype)


# ---------------------------------------------------------------------------
# pallas_call wrapper
# ---------------------------------------------------------------------------
def _fused_forward(x_chunks, layer_params, fc_w_t, fc_b, *,
                   tc, b_pad, t_total, compute_dtype):
    nc, tcb, d_in = x_chunks.shape
    num_layers = len(layer_params)
    h_dim = layer_params[0]["w_hh_t"].shape[0]
    o_dim = fc_w_t.shape[1]
    tail = t_total % tc

    kernel = functools.partial(_fused_rnn_fc_kernel, num_layers, tc, b_pad, tail)

    def resident(shape):
        nd = len(shape)
        # Constant index_map -> fetched once and kept; single buffer halves its footprint.
        return pl.BlockSpec(shape, lambda c: (0,) * nd, pipeline_mode=pl.Buffered(1))

    in_specs = [pl.BlockSpec((None, tcb, d_in), lambda c: (c, 0, 0))]   # one time chunk
    operands = [x_chunks]
    for l, p in enumerate(layer_params):
        din_l = d_in if l == 0 else h_dim
        in_specs += [resident((din_l, h_dim)),       # W_ih^T
                     resident((h_dim, h_dim)),       # W_hh^T
                     resident((1, h_dim))]           # combined bias (f32)
        operands += [p["w_ih_t"].astype(compute_dtype),
                     p["w_hh_t"].astype(compute_dtype),
                     p["b"]]
    in_specs += [resident((h_dim, o_dim)), resident((1, o_dim))]
    operands += [fc_w_t.astype(compute_dtype), fc_b]

    scratch = [pltpu.VMEM((b_pad, h_dim), jnp.float32) for _ in range(num_layers)]
    scratch += [pltpu.VMEM((tcb, h_dim), jnp.float32),       # hoisted x-projection
                pltpu.VMEM((tcb, h_dim), compute_dtype)]     # inter-layer hidden sequence

    return pl.pallas_call(
        kernel,
        out_shape=jax.ShapeDtypeStruct((b_pad, o_dim), jnp.float32),
        grid_spec=pltpu.PrefetchScalarGridSpec(
            num_scalar_prefetch=0,
            grid=(nc,),
            in_specs=in_specs,
            out_specs=pl.BlockSpec((b_pad, o_dim), lambda c: (0, 0)),   # resident output
            scratch_shapes=scratch,
        ),
        compiler_params=pltpu.CompilerParams(
            dimension_semantics=("arbitrary",),       # strict time recurrence
            vmem_limit_bytes=_vmem_limit_bytes(),
        ),
    )(*operands)


# ---------------------------------------------------------------------------
# Parameters & forward
# ---------------------------------------------------------------------------
def init_params(key, input_dim, hidden_dim, layer_dim, output_dim):
    """Deterministic init mimicking PyTorch's uniform(-1/sqrt(H), 1/sqrt(H))."""
    params = {"layers": []}
    bound = 1.0 / jnp.sqrt(jnp.float32(hidden_dim))
    for l in range(layer_dim):
        d_in = input_dim if l == 0 else hidden_dim
        key, k1, k2, k3, k4 = jax.random.split(key, 5)
        w_ih = jax.random.uniform(k1, (hidden_dim, d_in), jnp.float32, -bound, bound)
        w_hh = jax.random.uniform(k2, (hidden_dim, hidden_dim), jnp.float32, -bound, bound)
        b_ih = jax.random.uniform(k3, (hidden_dim,), jnp.float32, -bound, bound)
        b_hh = jax.random.uniform(k4, (hidden_dim,), jnp.float32, -bound, bound)
        params["layers"].append(
            dict(
                w_ih_t=w_ih.T,                            # (D_in, H)
                w_hh_t=w_hh.T,                            # (H, H)
                b=(b_ih + b_hh).reshape(1, hidden_dim),   # (1, H), f32
            )
        )
    key, k1, k2 = jax.random.split(key, 3)
    fcb = 1.0 / jnp.sqrt(jnp.float32(hidden_dim))
    w_fc = jax.random.uniform(k1, (output_dim, hidden_dim), jnp.float32, -fcb, fcb)
    b_fc = jax.random.uniform(k2, (output_dim,), jnp.float32, -fcb, fcb)
    params["fc_w_t"] = w_fc.T                             # (H, O)
    params["fc_b"] = b_fc.reshape(1, output_dim)          # (1, O)
    return params


@functools.partial(jax.jit, static_argnames=("compute_dtype", "time_chunk"))
def rnn_model_forward(x, params, *, compute_dtype=jnp.float32, time_chunk=128):
    """Equivalent of RNNModel.forward: multi-layer tanh RNN -> last timestep -> Linear."""
    B, T, D = x.shape
    layers = params["layers"]
    h_dim = layers[0]["w_hh_t"].shape[0]
    o_dim = params["fc_w_t"].shape[1]

    # Sublane-tile batch padding: 8 rows for f32 operands, 16 for bf16.
    b_mult = 8 * (4 // jnp.dtype(compute_dtype).itemsize)
    b_pad = max(b_mult, pl.cdiv(B, b_mult) * b_mult)

    tc = _choose_time_chunk(time_chunk, T, b_pad, D, h_dim, o_dim,
                            len(layers), compute_dtype,
                            vmem_budget=(_vmem_limit_bytes() * 3) // 4)
    nc = pl.cdiv(T, tc)
    t_pad = nc * tc

    # Layout plumbing (XLA side): time-major, padded, chunked, lane-dense.
    x_tm = jnp.transpose(x, (1, 0, 2))                                  # (T, B, D)
    x_tm = jnp.pad(x_tm, ((0, t_pad - T), (0, b_pad - B), (0, 0)))      # zero pad
    x_chunks = x_tm.reshape(nc, tc * b_pad, D).astype(compute_dtype)    # (nc, tc*B', D)

    out = _fused_forward(x_chunks, layers, params["fc_w_t"], params["fc_b"],
                         tc=tc, b_pad=b_pad, t_total=T, compute_dtype=compute_dtype)
    return out[:B]                                        # drop batch padding


def _reference_forward(x, params):
    """Pure-JAX reference of the same math, for a sanity check."""
    h_seq = x
    for layer in params["layers"]:
        B, T, _ = h_seq.shape
        H = layer["w_hh_t"].shape[0]
        h = jnp.zeros((B, H), jnp.float32)
        outs = []
        for t in range(T):
            h = jnp.tanh(
                h_seq[:, t, :] @ layer["w_ih_t"] + h @ layer["w_hh_t"] + layer["b"]
            )
            outs.append(h)
        h_seq = jnp.stack(outs, axis=1)
    return h_seq[:, -1, :] @ params["fc_w_t"] + params["fc_b"]


if __name__ == "__main__":
    # Small shapes consistent with the module.
    B, T = 2, 8
    input_dim, hidden_dim, layer_dim, output_dim = 16, 32, 2, 4
    dropout_prob = 0.1  # unused at inference (identity)

    key = jax.random.PRNGKey(0)
    key, kx = jax.random.split(key)
    x = jax.random.normal(kx, (B, T, input_dim), jnp.float32)

    params = init_params(key, input_dim, hidden_dim, layer_dim, output_dim)
    ref = _reference_forward(x, params)

    # f32 path: check against the pure-JAX reference.
    out = rnn_model_forward(x, params)
    out = jax.block_until_ready(out)
    assert out.shape == (B, output_dim), out.shape
    assert jnp.allclose(out, ref, atol=1e-4, rtol=1e-4), (out, ref)

    # bf16-MXU path (v6e/v7x friendly): f32 accumulation/state/tanh, loose tolerance.
    out_bf16 = rnn_model_forward(x, params, compute_dtype=jnp.bfloat16)
    out_bf16 = jax.block_until_ready(out_bf16)
    assert out_bf16.shape == (B, output_dim), out_bf16.shape
    assert bool(jnp.all(jnp.isfinite(out_bf16)))
    assert jnp.allclose(out_bf16, ref, atol=1e-1, rtol=1e-1), (out_bf16, ref)

    print("KERNEL_OK")
</pallas_src>

<mosaic_0001>
module attributes {stable_mosaic.version = 11 : i64} {
  func.func @_fused_rnn_fc_kernel(%arg0: i32, %arg1: memref<1x64x16xf32, #tpu.memory_space<vmem>>, %arg2: memref<16x32xf32, #tpu.memory_space<vmem>>, %arg3: memref<32x32xf32, #tpu.memory_space<vmem>>, %arg4: memref<1x32xf32, #tpu.memory_space<vmem>>, %arg5: memref<32x32xf32, #tpu.memory_space<vmem>>, %arg6: memref<32x32xf32, #tpu.memory_space<vmem>>, %arg7: memref<1x32xf32, #tpu.memory_space<vmem>>, %arg8: memref<32x4xf32, #tpu.memory_space<vmem>>, %arg9: memref<1x4xf32, #tpu.memory_space<vmem>>, %arg10: memref<8x4xf32, #tpu.memory_space<vmem>>, %arg11: memref<8x32xf32, #tpu.memory_space<vmem>>, %arg12: memref<8x32xf32, #tpu.memory_space<vmem>>, %arg13: memref<64x32xf32, #tpu.memory_space<vmem>>, %arg14: memref<64x32xf32, #tpu.memory_space<vmem>>) attributes {dimension_semantics = [#tpu.dimension_semantics<arbitrary>], iteration_bounds = array<i64: 1>, scalar_prefetch = 0 : i64, scratch_operands = 4 : i64, tpu.core_type = #tpu.core_type<tc>, window_params = [{transform_indices = @transform_0, window_bounds = array<i64: 1, 64, 16>}, {pipeline_mode = #tpu.pipeline_mode<synchronous>, transform_indices = @transform_1, window_bounds = array<i64: 16, 32>}, {pipeline_mode = #tpu.pipeline_mode<synchronous>, transform_indices = @transform_2, window_bounds = array<i64: 32, 32>}, {pipeline_mode = #tpu.pipeline_mode<synchronous>, transform_indices = @transform_3, window_bounds = array<i64: 1, 32>}, {pipeline_mode = #tpu.pipeline_mode<synchronous>, transform_indices = @transform_4, window_bounds = array<i64: 32, 32>}, {pipeline_mode = #tpu.pipeline_mode<synchronous>, transform_indices = @transform_5, window_bounds = array<i64: 32, 32>}, {pipeline_mode = #tpu.pipeline_mode<synchronous>, transform_indices = @transform_6, window_bounds = array<i64: 1, 32>}, {pipeline_mode = #tpu.pipeline_mode<synchronous>, transform_indices = @transform_7, window_bounds = array<i64: 32, 4>}, {pipeline_mode = #tpu.pipeline_mode<synchronous>, transform_indices = @transform_8, window_bounds = array<i64: 1, 4>}, {pipeline_mode = #tpu.pipeline_mode<synchronous>, transform_indices = @transform_9, window_bounds = array<i64: 8, 4>}]} {
    %c0_i32 = arith.constant 0 : i32
    %0 = arith.cmpi eq, %arg0, %c0_i32 : i32
    %1 = arith.extui %0 : i1 to i32
    %c0_i32_0 = arith.constant 0 : i32
    %2 = arith.cmpi ne, %1, %c0_i32_0 : i32
    scf.if %2 {
      %cst_182 = arith.constant 0.000000e+00 : f32
      %197 = vector.broadcast %cst_182 : f32 to vector<8x32xf32>
      %c0_183 = arith.constant 0 : index
      %c0_184 = arith.constant 0 : index
      %198 = vector.load %arg11[%c0_183, %c0_184] : memref<8x32xf32, #tpu.memory_space<vmem>>, vector<8x32xf32>
      tpu.vector_store %arg11[%c0_183, %c0_184], %197 {strides = array<i32>} : memref<8x32xf32, #tpu.memory_space<vmem>>, vector<8x32xf32>,
      %cst_185 = arith.constant 0.000000e+00 : f32
      %199 = vector.broadcast %cst_185 : f32 to vector<8x32xf32>
      %c0_186 = arith.constant 0 : index
      %c0_187 = arith.constant 0 : index
      %200 = vector.load %arg12[%c0_186, %c0_187] : memref<8x32xf32, #tpu.memory_space<vmem>>, vector<8x32xf32>
      tpu.vector_store %arg12[%c0_186, %c0_187], %199 {strides = array<i32>} : memref<8x32xf32, #tpu.memory_space<vmem>>, vector<8x32xf32>,
      %cst_188 = arith.constant 0.000000e+00 : f32
      %201 = vector.broadcast %cst_188 : f32 to vector<8x4xf32>
      %c0_189 = arith.constant 0 : index
      %c0_190 = arith.constant 0 : index
      %202 = vector.load %arg10[%c0_189, %c0_190] : memref<8x4xf32, #tpu.memory_space<vmem>>, vector<8x4xf32>
      tpu.vector_store %arg10[%c0_189, %c0_190], %201 {strides = array<i32>} : memref<8x4xf32, #tpu.memory_space<vmem>>, vector<8x4xf32>,
    } else {
    }
    %c0 = arith.constant 0 : index
    %c0_1 = arith.constant 0 : index
    %c0_2 = arith.constant 0 : index
    %3 = vector.load %arg1[%c0, %c0_1, %c0_2] : memref<1x64x16xf32, #tpu.memory_space<vmem>>, vector<1x64x16xf32>
    %4 = vector.shape_cast %3 : vector<1x64x16xf32> to vector<64x16xf32>
    %c0_3 = arith.constant 0 : index
    %c0_4 = arith.constant 0 : index
    %5 = vector.load %arg2[%c0_3, %c0_4] : memref<16x32xf32, #tpu.memory_space<vmem>>, vector<16x32xf32>
    %cst = arith.constant dense<0.000000e+00> : vector<64x32xf32>
    %6 = tpu.matmul %4, %5, %cst {dimension_numbers = #tpu.dot_dimension_numbers<[1], [0], [0], [1], [0, 0, 1, 1], [], []>} : vector<64x16xf32>, vector<16x32xf32>, vector<64x32xf32> -> vector<64x32xf32>
    %c0_5 = arith.constant 0 : index
    %c0_6 = arith.constant 0 : index
    %7 = vector.load %arg4[%c0_5, %c0_6] : memref<1x32xf32, #tpu.memory_space<vmem>>, vector<1x32xf32>
    %8 = vector.broadcast %7 : vector<1x32xf32> to vector<64x32xf32>
    %9 = arith.addf %6, %8 : vector<64x32xf32>
    %c0_7 = arith.constant 0 : index
    %c0_8 = arith.constant 0 : index
    %10 = vector.load %arg13[%c0_7, %c0_8] : memref<64x32xf32, #tpu.memory_space<vmem>>, vector<64x32xf32>
    tpu.vector_store %arg13[%c0_7, %c0_8], %9 {strides = array<i32>} : memref<64x32xf32, #tpu.memory_space<vmem>>, vector<64x32xf32>,
    %c0_i32_9 = arith.constant 0 : i32
    %c8_i32 = arith.constant 8 : i32
    %11 = arith.muli %c0_i32_9, %c8_i32 : i32
    %12 = tpu.assume_multiple %11, 8 : i32
    %13 = arith.index_cast %12 : i32 to index
    %c0_10 = arith.constant 0 : index
    %14 = vector.load %arg13[%13, %c0_10] : memref<64x32xf32, #tpu.memory_space<vmem>>, vector<8x32xf32>
    %c0_11 = arith.constant 0 : index
    %c0_12 = arith.constant 0 : index
    %15 = vector.load %arg11[%c0_11, %c0_12] : memref<8x32xf32, #tpu.memory_space<vmem>>, vector<8x32xf32>
    %c0_13 = arith.constant 0 : index
    %c0_14 = arith.constant 0 : index
    %16 = vector.load %arg3[%c0_13, %c0_14] : memref<32x32xf32, #tpu.memory_space<vmem>>, vector<32x32xf32>
    %cst_15 = arith.constant dense<0.000000e+00> : vector<8x32xf32>
    %17 = tpu.matmul %15, %16, %cst_15 {dimension_numbers = #tpu.dot_dimension_numbers<[1], [0], [0], [1], [0, 0, 1, 1], [], []>} : vector<8x32xf32>, vector<32x32xf32>, vector<8x32xf32> -> vector<8x32xf32>
    %18 = arith.addf %14, %17 : vector<8x32xf32>
    %19 = math.tanh %18 : vector<8x32xf32>
    %c0_16 = arith.constant 0 : index
    %c0_17 = arith.constant 0 : index
    %20 = vector.load %arg11[%c0_16, %c0_17] : memref<8x32xf32, #tpu.memory_space<vmem>>, vector<8x32xf32>
    tpu.vector_store %arg11[%c0_16, %c0_17], %19 {strides = array<i32>} : memref<8x32xf32, #tpu.memory_space<vmem>>, vector<8x32xf32>,
    %21 = arith.index_cast %12 : i32 to index
    %c0_18 = arith.constant 0 : index
    %22 = vector.load %arg14[%21, %c0_18] : memref<64x32xf32, #tpu.memory_space<vmem>>, vector<8x32xf32>
    tpu.vector_store %arg14[%21, %c0_18], %19 {strides = array<i32>} : memref<64x32xf32, #tpu.memory_space<vmem>>, vector<8x32xf32>,
    %c1_i32 = arith.constant 1 : i32
    %c8_i32_19 = arith.constant 8 : i32
    %23 = arith.muli %c1_i32, %c8_i32_19 : i32
    %24 = tpu.assume_multiple %23, 8 : i32
    %25 = arith.index_cast %24 : i32 to index
    %c0_20 = arith.constant 0 : index
    %26 = vector.load %arg13[%25, %c0_20] : memref<64x32xf32, #tpu.memory_space<vmem>>, vector<8x32xf32>
    %c0_21 = arith.constant 0 : index
    %c0_22 = arith.constant 0 : index
    %27 = vector.load %arg11[%c0_21, %c0_22] : memref<8x32xf32, #tpu.memory_space<vmem>>, vector<8x32xf32>
    %c0_23 = arith.constant 0 : index
    %c0_24 = arith.constant 0 : index
    %28 = vector.load %arg3[%c0_23, %c0_24] : memref<32x32xf32, #tpu.memory_space<vmem>>, vector<32x32xf32>
    %cst_25 = arith.constant dense<0.000000e+00> : vector<8x32xf32>
    %29 = tpu.matmul %27, %28, %cst_25 {dimension_numbers = #tpu.dot_dimension_numbers<[1], [0], [0], [1], [0, 0, 1, 1], [], []>} : vector<8x32xf32>, vector<32x32xf32>, vector<8x32xf32> -> vector<8x32xf32>
    %30 = arith.addf %26, %29 : vector<8x32xf32>
    %31 = math.tanh %30 : vector<8x32xf32>
    %c0_26 = arith.constant 0 : index
    %c0_27 = arith.constant 0 : index
    %32 = vector.load %arg11[%c0_26, %c0_27] : memref<8x32xf32, #tpu.memory_space<vmem>>, vector<8x32xf32>
    tpu.vector_store %arg11[%c0_26, %c0_27], %31 {strides = array<i32>} : memref<8x32xf32, #tpu.memory_space<vmem>>, vector<8x32xf32>,
    %33 = arith.index_cast %24 : i32 to index
    %c0_28 = arith.constant 0 : index
    %34 = vector.load %arg14[%33, %c0_28] : memref<64x32xf32, #tpu.memory_space<vmem>>, vector<8x32xf32>
    tpu.vector_store %arg14[%33, %c0_28], %31 {strides = array<i32>} : memref<64x32xf32, #tpu.memory_space<vmem>>, vector<8x32xf32>,
    %c2_i32 = arith.constant 2 : i32
    %c8_i32_29 = arith.constant 8 : i32
    %35 = arith.muli %c2_i32, %c8_i32_29 : i32
    %36 = tpu.assume_multiple %35, 8 : i32
    %37 = arith.index_cast %36 : i32 to index
    %c0_30 = arith.constant 0 : index
    %38 = vector.load %arg13[%37, %c0_30] : memref<64x32xf32, #tpu.memory_space<vmem>>, vector<8x32xf32>
    %c0_31 = arith.constant 0 : index
    %c0_32 = arith.constant 0 : index
    %39 = vector.load %arg11[%c0_31, %c0_32] : memref<8x32xf32, #tpu.memory_space<vmem>>, vector<8x32xf32>
    %c0_33 = arith.constant 0 : index
    %c0_34 = arith.constant 0 : index
    %40 = vector.load %arg3[%c0_33, %c0_34] : memref<32x32xf32, #tpu.memory_space<vmem>>, vector<32x32xf32>
    %cst_35 = arith.constant dense<0.000000e+00> : vector<8x32xf32>
    %41 = tpu.matmul %39, %40, %cst_35 {dimension_numbers = #tpu.dot_dimension_numbers<[1], [0], [0], [1], [0, 0, 1, 1], [], []>} : vector<8x32xf32>, vector<32x32xf32>, vector<8x32xf32> -> vector<8x32xf32>
    %42 = arith.addf %38, %41 : vector<8x32xf32>
    %43 = math.tanh %42 : vector<8x32xf32>
    %c0_36 = arith.constant 0 : index
    %c0_37 = arith.constant 0 : index
    %44 = vector.load %arg11[%c0_36, %c0_37] : memref<8x32xf32, #tpu.memory_space<vmem>>, vector<8x32xf32>
    tpu.vector_store %arg11[%c0_36, %c0_37], %43 {strides = array<i32>} : memref<8x32xf32, #tpu.memory_space<vmem>>, vector<8x32xf32>,
    %45 = arith.index_cast %36 : i32 to index
    %c0_38 = arith.constant 0 : index
    %46 = vector.load %arg14[%45, %c0_38] : memref<64x32xf32, #tpu.memory_space<vmem>>, vector<8x32xf32>
    tpu.vector_store %arg14[%45, %c0_38], %43 {strides = array<i32>} : memref<64x32xf32, #tpu.memory_space<vmem>>, vector<8x32xf32>,
    %c3_i32 = arith.constant 3 : i32
    %c8_i32_39 = arith.constant 8 : i32
    %47 = arith.muli %c3_i32, %c8_i32_39 : i32
    %48 = tpu.assume_multiple %47, 8 : i32
    %49 = arith.index_cast %48 : i32 to index
    %c0_40 = arith.constant 0 : index
    %50 = vector.load %arg13[%49, %c0_40] : memref<64x32xf32, #tpu.memory_space<vmem>>, vector<8x32xf32>
    %c0_41 = arith.constant 0 : index
    %c0_42 = arith.constant 0 : index
    %51 = vector.load %arg11[%c0_41, %c0_42] : memref<8x32xf32, #tpu.memory_space<vmem>>, vector<8x32xf32>
    %c0_43 = arith.constant 0 : index
    %c0_44 = arith.constant 0 : index
    %52 = vector.load %arg3[%c0_43, %c0_44] : memref<32x32xf32, #tpu.memory_space<vmem>>, vector<32x32xf32>
    %cst_45 = arith.constant dense<0.000000e+00> : vector<8x32xf32>
    %53 = tpu.matmul %51, %52, %cst_45 {dimension_numbers = #tpu.dot_dimension_numbers<[1], [0], [0], [1], [0, 0, 1, 1], [], []>} : vector<8x32xf32>, vector<32x32xf32>, vector<8x32xf32> -> vector<8x32xf32>
    %54 = arith.addf %50, %53 : vector<8x32xf32>
    %55 = math.tanh %54 : vector<8x32xf32>
    %c0_46 = arith.constant 0 : index
    %c0_47 = arith.constant 0 : index
    %56 = vector.load %arg11[%c0_46, %c0_47] : memref<8x32xf32, #tpu.memory_space<vmem>>, vector<8x32xf32>
    tpu.vector_store %arg11[%c0_46, %c0_47], %55 {strides = array<i32>} : memref<8x32xf32, #tpu.memory_space<vmem>>, vector<8x32xf32>,
    %57 = arith.index_cast %48 : i32 to index
    %c0_48 = arith.constant 0 : index
    %58 = vector.load %arg14[%57, %c0_48] : memref<64x32xf32, #tpu.memory_space<vmem>>, vector<8x32xf32>
    tpu.vector_store %arg14[%57, %c0_48], %55 {strides = array<i32>} : memref<64x32xf32, #tpu.memory_space<vmem>>, vector<8x32xf32>,
    %c4_i32 = arith.constant 4 : i32
    %c8_i32_49 = arith.constant 8 : i32
    %59 = arith.muli %c4_i32, %c8_i32_49 : i32
    %60 = tpu.assume_multiple %59, 8 : i32
    %61 = arith.index_cast %60 : i32 to index
    %c0_50 = arith.constant 0 : index
    %62 = vector.load %arg13[%61, %c0_50] : memref<64x32xf32, #tpu.memory_space<vmem>>, vector<8x32xf32>
    %c0_51 = arith.constant 0 : index
    %c0_52 = arith.constant 0 : index
    %63 = vector.load %arg11[%c0_51, %c0_52] : memref<8x32xf32, #tpu.memory_space<vmem>>, vector<8x32xf32>
    %c0_53 = arith.constant 0 : index
    %c0_54 = arith.constant 0 : index
    %64 = vector.load %arg3[%c0_53, %c0_54] : memref<32x32xf32, #tpu.memory_space<vmem>>, vector<32x32xf32>
    %cst_55 = arith.constant dense<0.000000e+00> : vector<8x32xf32>
    %65 = tpu.matmul %63, %64, %cst_55 {dimension_numbers = #tpu.dot_dimension_numbers<[1], [0], [0], [1], [0, 0, 1, 1], [], []>} : vector<8x32xf32>, vector<32x32xf32>, vector<8x32xf32> -> vector<8x32xf32>
    %66 = arith.addf %62, %65 : vector<8x32xf32>
    %67 = math.tanh %66 : vector<8x32xf32>
    %c0_56 = arith.constant 0 : index
    %c0_57 = arith.constant 0 : index
    %68 = vector.load %arg11[%c0_56, %c0_57] : memref<8x32xf32, #tpu.memory_space<vmem>>, vector<8x32xf32>
    tpu.vector_store %arg11[%c0_56, %c0_57], %67 {strides = array<i32>} : memref<8x32xf32, #tpu.memory_space<vmem>>, vector<8x32xf32>,
    %69 = arith.index_cast %60 : i32 to index
    %c0_58 = arith.constant 0 : index
    %70 = vector.load %arg14[%69, %c0_58] : memref<64x32xf32, #tpu.memory_space<vmem>>, vector<8x32xf32>
    tpu.vector_store %arg14[%69, %c0_58], %67 {strides = array<i32>} : memref<64x32xf32, #tpu.memory_space<vmem>>, vector<8x32xf32>,
    %c5_i32 = arith.constant 5 : i32
    %c8_i32_59 = arith.constant 8 : i32
    %71 = arith.muli %c5_i32, %c8_i32_59 : i32
    %72 = tpu.assume_multiple %71, 8 : i32
    %73 = arith.index_cast %72 : i32 to index
    %c0_60 = arith.constant 0 : index
    %74 = vector.load %arg13[%73, %c0_60] : memref<64x32xf32, #tpu.memory_space<vmem>>, vector<8x32xf32>
    %c0_61 = arith.constant 0 : index
    %c0_62 = arith.constant 0 : index
    %75 = vector.load %arg11[%c0_61, %c0_62] : memref<8x32xf32, #tpu.memory_space<vmem>>, vector<8x32xf32>
    %c0_63 = arith.constant 0 : index
    %c0_64 = arith.constant 0 : index
    %76 = vector.load %arg3[%c0_63, %c0_64] : memref<32x32xf32, #tpu.memory_space<vmem>>, vector<32x32xf32>
    %cst_65 = arith.constant dense<0.000000e+00> : vector<8x32xf32>
    %77 = tpu.matmul %75, %76, %cst_65 {dimension_numbers = #tpu.dot_dimension_numbers<[1], [0], [0], [1], [0, 0, 1, 1], [], []>} : vector<8x32xf32>, vector<32x32xf32>, vector<8x32xf32> -> vector<8x32xf32>
    %78 = arith.addf %74, %77 : vector<8x32xf32>
    %79 = math.tanh %78 : vector<8x32xf32>
    %c0_66 = arith.constant 0 : index
    %c0_67 = arith.constant 0 : index
    %80 = vector.load %arg11[%c0_66, %c0_67] : memref<8x32xf32, #tpu.memory_space<vmem>>, vector<8x32xf32>
    tpu.vector_store %arg11[%c0_66, %c0_67], %79 {strides = array<i32>} : memref<8x32xf32, #tpu.memory_space<vmem>>, vector<8x32xf32>,
    %81 = arith.index_cast %72 : i32 to index
    %c0_68 = arith.constant 0 : index
    %82 = vector.load %arg14[%81, %c0_68] : memref<64x32xf32, #tpu.memory_space<vmem>>, vector<8x32xf32>
    tpu.vector_store %arg14[%81, %c0_68], %79 {strides = array<i32>} : memref<64x32xf32, #tpu.memory_space<vmem>>, vector<8x32xf32>,
    %c6_i32 = arith.constant 6 : i32
    %c8_i32_69 = arith.constant 8 : i32
    %83 = arith.muli %c6_i32, %c8_i32_69 : i32
    %84 = tpu.assume_multiple %83, 8 : i32
    %85 = arith.index_cast %84 : i32 to index
    %c0_70 = arith.constant 0 : index
    %86 = vector.load %arg13[%85, %c0_70] : memref<64x32xf32, #tpu.memory_space<vmem>>, vector<8x32xf32>
    %c0_71 = arith.constant 0 : index
    %c0_72 = arith.constant 0 : index
    %87 = vector.load %arg11[%c0_71, %c0_72] : memref<8x32xf32, #tpu.memory_space<vmem>>, vector<8x32xf32>
    %c0_73 = arith.constant 0 : index
    %c0_74 = arith.constant 0 : index
    %88 = vector.load %arg3[%c0_73, %c0_74] : memref<32x32xf32, #tpu.memory_space<vmem>>, vector<32x32xf32>
    %cst_75 = arith.constant dense<0.000000e+00> : vector<8x32xf32>
    %89 = tpu.matmul %87, %88, %cst_75 {dimension_numbers = #tpu.dot_dimension_numbers<[1], [0], [0], [1], [0, 0, 1, 1], [], []>} : vector<8x32xf32>, vector<32x32xf32>, vector<8x32xf32> -> vector<8x32xf32>
    %90 = arith.addf %86, %89 : vector<8x32xf32>
    %91 = math.tanh %90 : vector<8x32xf32>
    %c0_76 = arith.constant 0 : index
    %c0_77 = arith.constant 0 : index
    %92 = vector.load %arg11[%c0_76, %c0_77] : memref<8x32xf32, #tpu.memory_space<vmem>>, vector<8x32xf32>
    tpu.vector_store %arg11[%c0_76, %c0_77], %91 {strides = array<i32>} : memref<8x32xf32, #tpu.memory_space<vmem>>, vector<8x32xf32>,
    %93 = arith.index_cast %84 : i32 to index
    %c0_78 = arith.constant 0 : index
    %94 = vector.load %arg14[%93, %c0_78] : memref<64x32xf32, #tpu.memory_space<vmem>>, vector<8x32xf32>
    tpu.vector_store %arg14[%93, %c0_78], %91 {strides = array<i32>} : memref<64x32xf32, #tpu.memory_space<vmem>>, vector<8x32xf32>,
    %c7_i32 = arith.constant 7 : i32
    %c8_i32_79 = arith.constant 8 : i32
    %95 = arith.muli %c7_i32, %c8_i32_79 : i32
    %96 = tpu.assume_multiple %95, 8 : i32
    %97 = arith.index_cast %96 : i32 to index
    %c0_80 = arith.constant 0 : index
    %98 = vector.load %arg13[%97, %c0_80] : memref<64x32xf32, #tpu.memory_space<vmem>>, vector<8x32xf32>
    %c0_81 = arith.constant 0 : index
    %c0_82 = arith.constant 0 : index
    %99 = vector.load %arg11[%c0_81, %c0_82] : memref<8x32xf32, #tpu.memory_space<vmem>>, vector<8x32xf32>
    %c0_83 = arith.constant 0 : index
    %c0_84 = arith.constant 0 : index
    %100 = vector.load %arg3[%c0_83, %c0_84] : memref<32x32xf32, #tpu.memory_space<vmem>>, vector<32x32xf32>
    %cst_85 = arith.constant dense<0.000000e+00> : vector<8x32xf32>
    %101 = tpu.matmul %99, %100, %cst_85 {dimension_numbers = #tpu.dot_dimension_numbers<[1], [0], [0], [1], [0, 0, 1, 1], [], []>} : vector<8x32xf32>, vector<32x32xf32>, vector<8x32xf32> -> vector<8x32xf32>
    %102 = arith.addf %98, %101 : vector<8x32xf32>
    %103 = math.tanh %102 : vector<8x32xf32>
    %c0_86 = arith.constant 0 : index
    %c0_87 = arith.constant 0 : index
    %104 = vector.load %arg11[%c0_86, %c0_87] : memref<8x32xf32, #tpu.memory_space<vmem>>, vector<8x32xf32>
    tpu.vector_store %arg11[%c0_86, %c0_87], %103 {strides = array<i32>} : memref<8x32xf32, #tpu.memory_space<vmem>>, vector<8x32xf32>,
    %105 = arith.index_cast %96 : i32 to index
    %c0_88 = arith.constant 0 : index
    %106 = vector.load %arg14[%105, %c0_88] : memref<64x32xf32, #tpu.memory_space<vmem>>, vector<8x32xf32>
    tpu.vector_store %arg14[%105, %c0_88], %103 {strides = array<i32>} : memref<64x32xf32, #tpu.memory_space<vmem>>, vector<8x32xf32>,
    %c8_i32_89 = arith.constant 8 : i32
    %c0_90 = arith.constant 0 : index
    %c0_91 = arith.constant 0 : index
    %107 = vector.load %arg14[%c0_90, %c0_91] : memref<64x32xf32, #tpu.memory_space<vmem>>, vector<64x32xf32>
    %c0_92 = arith.constant 0 : index
    %c0_93 = arith.constant 0 : index
    %108 = vector.load %arg5[%c0_92, %c0_93] : memref<32x32xf32, #tpu.memory_space<vmem>>, vector<32x32xf32>
    %cst_94 = arith.constant dense<0.000000e+00> : vector<64x32xf32>
    %109 = tpu.matmul %107, %108, %cst_94 {dimension_numbers = #tpu.dot_dimension_numbers<[1], [0], [0], [1], [0, 0, 1, 1], [], []>} : vector<64x32xf32>, vector<32x32xf32>, vector<64x32xf32> -> vector<64x32xf32>
    %c0_95 = arith.constant 0 : index
    %c0_96 = arith.constant 0 : index
    %110 = vector.load %arg7[%c0_95, %c0_96] : memref<1x32xf32, #tpu.memory_space<vmem>>, vector<1x32xf32>
    %111 = vector.broadcast %110 : vector<1x32xf32> to vector<64x32xf32>
    %112 = arith.addf %109, %111 : vector<64x32xf32>
    %c0_97 = arith.constant 0 : index
    %c0_98 = arith.constant 0 : index
    %113 = vector.load %arg13[%c0_97, %c0_98] : memref<64x32xf32, #tpu.memory_space<vmem>>, vector<64x32xf32>
    tpu.vector_store %arg13[%c0_97, %c0_98], %112 {strides = array<i32>} : memref<64x32xf32, #tpu.memory_space<vmem>>, vector<64x32xf32>,
    %c0_i32_99 = arith.constant 0 : i32
    %c8_i32_100 = arith.constant 8 : i32
    %114 = arith.muli %c0_i32_99, %c8_i32_100 : i32
    %115 = tpu.assume_multiple %114, 8 : i32
    %116 = arith.index_cast %115 : i32 to index
    %c0_101 = arith.constant 0 : index
    %117 = vector.load %arg13[%116, %c0_101] : memref<64x32xf32, #tpu.memory_space<vmem>>, vector<8x32xf32>
    %c0_102 = arith.constant 0 : index
    %c0_103 = arith.constant 0 : index
    %118 = vector.load %arg12[%c0_102, %c0_103] : memref<8x32xf32, #tpu.memory_space<vmem>>, vector<8x32xf32>
    %c0_104 = arith.constant 0 : index
    %c0_105 = arith.constant 0 : index
    %119 = vector.load %arg6[%c0_104, %c0_105] : memref<32x32xf32, #tpu.memory_space<vmem>>, vector<32x32xf32>
    %cst_106 = arith.constant dense<0.000000e+00> : vector<8x32xf32>
    %120 = tpu.matmul %118, %119, %cst_106 {dimension_numbers = #tpu.dot_dimension_numbers<[1], [0], [0], [1], [0, 0, 1, 1], [], []>} : vector<8x32xf32>, vector<32x32xf32>, vector<8x32xf32> -> vector<8x32xf32>
    %121 = arith.addf %117, %120 : vector<8x32xf32>
    %122 = math.tanh %121 : vector<8x32xf32>
    %c0_107 = arith.constant 0 : index
    %c0_108 = arith.constant 0 : index
    %123 = vector.load %arg12[%c0_107, %c0_108] : memref<8x32xf32, #tpu.memory_space<vmem>>, vector<8x32xf32>
    tpu.vector_store %arg12[%c0_107, %c0_108], %122 {strides = array<i32>} : memref<8x32xf32, #tpu.memory_space<vmem>>, vector<8x32xf32>,
    %c1_i32_109 = arith.constant 1 : i32
    %c8_i32_110 = arith.constant 8 : i32
    %124 = arith.muli %c1_i32_109, %c8_i32_110 : i32
    %125 = tpu.assume_multiple %124, 8 : i32
    %126 = arith.index_cast %125 : i32 to index
    %c0_111 = arith.constant 0 : index
    %127 = vector.load %arg13[%126, %c0_111] : memref<64x32xf32, #tpu.memory_space<vmem>>, vector<8x32xf32>
    %c0_112 = arith.constant 0 : index
    %c0_113 = arith.constant 0 : index
    %128 = vector.load %arg12[%c0_112, %c0_113] : memref<8x32xf32, #tpu.memory_space<vmem>>, vector<8x32xf32>
    %c0_114 = arith.constant 0 : index
    %c0_115 = arith.constant 0 : index
    %129 = vector.load %arg6[%c0_114, %c0_115] : memref<32x32xf32, #tpu.memory_space<vmem>>, vector<32x32xf32>
    %cst_116 = arith.constant dense<0.000000e+00> : vector<8x32xf32>
    %130 = tpu.matmul %128, %129, %cst_116 {dimension_numbers = #tpu.dot_dimension_numbers<[1], [0], [0], [1], [0, 0, 1, 1], [], []>} : vector<8x32xf32>, vector<32x32xf32>, vector<8x32xf32> -> vector<8x32xf32>
    %131 = arith.addf %127, %130 : vector<8x32xf32>
    %132 = math.tanh %131 : vector<8x32xf32>
    %c0_117 = arith.constant 0 : index
    %c0_118 = arith.constant 0 : index
    %133 = vector.load %arg12[%c0_117, %c0_118] : memref<8x32xf32, #tpu.memory_space<vmem>>, vector<8x32xf32>
    tpu.vector_store %arg12[%c0_117, %c0_118], %132 {strides = array<i32>} : memref<8x32xf32, #tpu.memory_space<vmem>>, vector<8x32xf32>,
    %c2_i32_119 = arith.constant 2 : i32
    %c8_i32_120 = arith.constant 8 : i32
    %134 = arith.muli %c2_i32_119, %c8_i32_120 : i32
    %135 = tpu.assume_multiple %134, 8 : i32
    %136 = arith.index_cast %135 : i32 to index
    %c0_121 = arith.constant 0 : index
    %137 = vector.load %arg13[%136, %c0_121] : memref<64x32xf32, #tpu.memory_space<vmem>>, vector<8x32xf32>
    %c0_122 = arith.constant 0 : index
    %c0_123 = arith.constant 0 : index
    %138 = vector.load %arg12[%c0_122, %c0_123] : memref<8x32xf32, #tpu.memory_space<vmem>>, vector<8x32xf32>
    %c0_124 = arith.constant 0 : index
    %c0_125 = arith.constant 0 : index
    %139 = vector.load %arg6[%c0_124, %c0_125] : memref<32x32xf32, #tpu.memory_space<vmem>>, vector<32x32xf32>
    %cst_126 = arith.constant dense<0.000000e+00> : vector<8x32xf32>
    %140 = tpu.matmul %138, %139, %cst_126 {dimension_numbers = #tpu.dot_dimension_numbers<[1], [0], [0], [1], [0, 0, 1, 1], [], []>} : vector<8x32xf32>, vector<32x32xf32>, vector<8x32xf32> -> vector<8x32xf32>
    %141 = arith.addf %137, %140 : vector<8x32xf32>
    %142 = math.tanh %141 : vector<8x32xf32>
    %c0_127 = arith.constant 0 : index
    %c0_128 = arith.constant 0 : index
    %143 = vector.load %arg12[%c0_127, %c0_128] : memref<8x32xf32, #tpu.memory_space<vmem>>, vector<8x32xf32>
    tpu.vector_store %arg12[%c0_127, %c0_128], %142 {strides = array<i32>} : memref<8x32xf32, #tpu.memory_space<vmem>>, vector<8x32xf32>,
    %c3_i32_129 = arith.constant 3 : i32
    %c8_i32_130 = arith.constant 8 : i32
    %144 = arith.muli %c3_i32_129, %c8_i32_130 : i32
    %145 = tpu.assume_multiple %144, 8 : i32
    %146 = arith.index_cast %145 : i32 to index
    %c0_131 = arith.constant 0 : index
    %147 = vector.load %arg13[%146, %c0_131] : memref<64x32xf32, #tpu.memory_space<vmem>>, vector<8x32xf32>
    %c0_132 = arith.constant 0 : index
    %c0_133 = arith.constant 0 : index
    %148 = vector.load %arg12[%c0_132, %c0_133] : memref<8x32xf32, #tpu.memory_space<vmem>>, vector<8x32xf32>
    %c0_134 = arith.constant 0 : index
    %c0_135 = arith.constant 0 : index
    %149 = vector.load %arg6[%c0_134, %c0_135] : memref<32x32xf32, #tpu.memory_space<vmem>>, vector<32x32xf32>
    %cst_136 = arith.constant dense<0.000000e+00> : vector<8x32xf32>
    %150 = tpu.matmul %148, %149, %cst_136 {dimension_numbers = #tpu.dot_dimension_numbers<[1], [0], [0], [1], [0, 0, 1, 1], [], []>} : vector<8x32xf32>, vector<32x32xf32>, vector<8x32xf32> -> vector<8x32xf32>
    %151 = arith.addf %147, %150 : vector<8x32xf32>
    %152 = math.tanh %151 : vector<8x32xf32>
    %c0_137 = arith.constant 0 : index
    %c0_138 = arith.constant 0 : index
    %153 = vector.load %arg12[%c0_137, %c0_138] : memref<8x32xf32, #tpu.memory_space<vmem>>, vector<8x32xf32>
    tpu.vector_store %arg12[%c0_137, %c0_138], %152 {strides = array<i32>} : memref<8x32xf32, #tpu.memory_space<vmem>>, vector<8x32xf32>,
    %c4_i32_139 = arith.constant 4 : i32
    %c8_i32_140 = arith.constant 8 : i32
    %154 = arith.muli %c4_i32_139, %c8_i32_140 : i32
    %155 = tpu.assume_multiple %154, 8 : i32
    %156 = arith.index_cast %155 : i32 to index
    %c0_141 = arith.constant 0 : index
    %157 = vector.load %arg13[%156, %c0_141] : memref<64x32xf32, #tpu.memory_space<vmem>>, vector<8x32xf32>
    %c0_142 = arith.constant 0 : index
    %c0_143 = arith.constant 0 : index
    %158 = vector.load %arg12[%c0_142, %c0_143] : memref<8x32xf32, #tpu.memory_space<vmem>>, vector<8x32xf32>
    %c0_144 = arith.constant 0 : index
    %c0_145 = arith.constant 0 : index
    %159 = vector.load %arg6[%c0_144, %c0_145] : memref<32x32xf32, #tpu.memory_space<vmem>>, vector<32x32xf32>
    %cst_146 = arith.constant dense<0.000000e+00> : vector<8x32xf32>
    %160 = tpu.matmul %158, %159, %cst_146 {dimension_numbers = #tpu.dot_dimension_numbers<[1], [0], [0], [1], [0, 0, 1, 1], [], []>} : vector<8x32xf32>, vector<32x32xf32>, vector<8x32xf32> -> vector<8x32xf32>
    %161 = arith.addf %157, %160 : vector<8x32xf32>
    %162 = math.tanh %161 : vector<8x32xf32>
    %c0_147 = arith.constant 0 : index
    %c0_148 = arith.constant 0 : index
    %163 = vector.load %arg12[%c0_147, %c0_148] : memref<8x32xf32, #tpu.memory_space<vmem>>, vector<8x32xf32>
    tpu.vector_store %arg12[%c0_147, %c0_148], %162 {strides = array<i32>} : memref<8x32xf32, #tpu.memory_space<vmem>>, vector<8x32xf32>,
    %c5_i32_149 = arith.constant 5 : i32
    %c8_i32_150 = arith.constant 8 : i32
    %164 = arith.muli %c5_i32_149, %c8_i32_150 : i32
    %165 = tpu.assume_multiple %164, 8 : i32
    %166 = arith.index_cast %165 : i32 to index
    %c0_151 = arith.constant 0 : index
    %167 = vector.load %arg13[%166, %c0_151] : memref<64x32xf32, #tpu.memory_space<vmem>>, vector<8x32xf32>
    %c0_152 = arith.constant 0 : index
    %c0_153 = arith.constant 0 : index
    %168 = vector.load %arg12[%c0_152, %c0_153] : memref<8x32xf32, #tpu.memory_space<vmem>>, vector<8x32xf32>
    %c0_154 = arith.constant 0 : index
    %c0_155 = arith.constant 0 : index
    %169 = vector.load %arg6[%c0_154, %c0_155] : memref<32x32xf32, #tpu.memory_space<vmem>>, vector<32x32xf32>
    %cst_156 = arith.constant dense<0.000000e+00> : vector<8x32xf32>
    %170 = tpu.matmul %168, %169, %cst_156 {dimension_numbers = #tpu.dot_dimension_numbers<[1], [0], [0], [1], [0, 0, 1, 1], [], []>} : vector<8x32xf32>, vector<32x32xf32>, vector<8x32xf32> -> vector<8x32xf32>
    %171 = arith.addf %167, %170 : vector<8x32xf32>
    %172 = math.tanh %171 : vector<8x32xf32>
    %c0_157 = arith.constant 0 : index
    %c0_158 = arith.constant 0 : index
    %173 = vector.load %arg12[%c0_157, %c0_158] : memref<8x32xf32, #tpu.memory_space<vmem>>, vector<8x32xf32>
    tpu.vector_store %arg12[%c0_157, %c0_158], %172 {strides = array<i32>} : memref<8x32xf32, #tpu.memory_space<vmem>>, vector<8x32xf32>,
    %c6_i32_159 = arith.constant 6 : i32
    %c8_i32_160 = arith.constant 8 : i32
    %174 = arith.muli %c6_i32_159, %c8_i32_160 : i32
    %175 = tpu.assume_multiple %174, 8 : i32
    %176 = arith.index_cast %175 : i32 to index
    %c0_161 = arith.constant 0 : index
    %177 = vector.load %arg13[%176, %c0_161] : memref<64x32xf32, #tpu.memory_space<vmem>>, vector<8x32xf32>
    %c0_162 = arith.constant 0 : index
    %c0_163 = arith.constant 0 : index
    %178 = vector.load %arg12[%c0_162, %c0_163] : memref<8x32xf32, #tpu.memory_space<vmem>>, vector<8x32xf32>
    %c0_164 = arith.constant 0 : index
    %c0_165 = arith.constant 0 : index
    %179 = vector.load %arg6[%c0_164, %c0_165] : memref<32x32xf32, #tpu.memory_space<vmem>>, vector<32x32xf32>
    %cst_166 = arith.constant dense<0.000000e+00> : vector<8x32xf32>
    %180 = tpu.matmul %178, %179, %cst_166 {dimension_numbers = #tpu.dot_dimension_numbers<[1], [0], [0], [1], [0, 0, 1, 1], [], []>} : vector<8x32xf32>, vector<32x32xf32>, vector<8x32xf32> -> vector<8x32xf32>
    %181 = arith.addf %177, %180 : vector<8x32xf32>
    %182 = math.tanh %181 : vector<8x32xf32>
    %c0_167 = arith.constant 0 : index
    %c0_168 = arith.constant 0 : index
    %183 = vector.load %arg12[%c0_167, %c0_168] : memref<8x32xf32, #tpu.memory_space<vmem>>, vector<8x32xf32>
    tpu.vector_store %arg12[%c0_167, %c0_168], %182 {strides = array<i32>} : memref<8x32xf32, #tpu.memory_space<vmem>>, vector<8x32xf32>,
    %c7_i32_169 = arith.constant 7 : i32
    %c8_i32_170 = arith.constant 8 : i32
    %184 = arith.muli %c7_i32_169, %c8_i32_170 : i32
    %185 = tpu.assume_multiple %184, 8 : i32
    %186 = arith.index_cast %185 : i32 to index
    %c0_171 = arith.constant 0 : index
    %187 = vector.load %arg13[%186, %c0_171] : memref<64x32xf32, #tpu.memory_space<vmem>>, vector<8x32xf32>
    %c0_172 = arith.constant 0 : index
    %c0_173 = arith.constant 0 : index
    %188 = vector.load %arg12[%c0_172, %c0_173] : memref<8x32xf32, #tpu.memory_space<vmem>>, vector<8x32xf32>
    %c0_174 = arith.constant 0 : index
    %c0_175 = arith.constant 0 : index
    %189 = vector.load %arg6[%c0_174, %c0_175] : memref<32x32xf32, #tpu.memory_space<vmem>>, vector<32x32xf32>
    %cst_176 = arith.constant dense<0.000000e+00> : vector<8x32xf32>
    %190 = tpu.matmul %188, %189, %cst_176 {dimension_numbers = #tpu.dot_dimension_numbers<[1], [0], [0], [1], [0, 0, 1, 1], [], []>} : vector<8x32xf32>, vector<32x32xf32>, vector<8x32xf32> -> vector<8x32xf32>
    %191 = arith.addf %187, %190 : vector<8x32xf32>
    %192 = math.tanh %191 : vector<8x32xf32>
    %c0_177 = arith.constant 0 : index
    %c0_178 = arith.constant 0 : index
    %193 = vector.load %arg12[%c0_177, %c0_178] : memref<8x32xf32, #tpu.memory_space<vmem>>, vector<8x32xf32>
    tpu.vector_store %arg12[%c0_177, %c0_178], %192 {strides = array<i32>} : memref<8x32xf32, #tpu.memory_space<vmem>>, vector<8x32xf32>,
    %c8_i32_179 = arith.constant 8 : i32
    %c0_i32_180 = arith.constant 0 : i32
    %194 = arith.cmpi eq, %arg0, %c0_i32_180 : i32
    %195 = arith.extui %194 : i1 to i32
    %c0_i32_181 = arith.constant 0 : i32
    %196 = arith.cmpi ne, %195, %c0_i32_181 : i32
    scf.if %196 {
      %c0_182 = arith.constant 0 : index
      %c0_183 = arith.constant 0 : index
      %197 = vector.load %arg12[%c0_182, %c0_183] : memref<8x32xf32, #tpu.memory_space<vmem>>, vector<8x32xf32>
      %c0_184 = arith.constant 0 : index
      %c0_185 = arith.constant 0 : index
      %198 = vector.load %arg8[%c0_184, %c0_185] : memref<32x4xf32, #tpu.memory_space<vmem>>, vector<32x4xf32>
      %cst_186 = arith.constant dense<0.000000e+00> : vector<8x4xf32>
      %199 = tpu.matmul %197, %198, %cst_186 {dimension_numbers = #tpu.dot_dimension_numbers<[1], [0], [0], [1], [0, 0, 1, 1], [], []>} : vector<8x32xf32>, vector<32x4xf32>, vector<8x4xf32> -> vector<8x4xf32>
      %c0_187 = arith.constant 0 : index
      %c0_188 = arith.constant 0 : index
      %200 = vector.load %arg9[%c0_187, %c0_188] : memref<1x4xf32, #tpu.memory_space<vmem>>, vector<1x4xf32>
      %201 = vector.broadcast %200 : vector<1x4xf32> to vector<8x4xf32>
      %202 = arith.addf %199, %201 : vector<8x4xf32>
      %c0_189 = arith.constant 0 : index
      %c0_190 = arith.constant 0 : index
      %203 = vector.load %arg10[%c0_189, %c0_190] : memref<8x4xf32, #tpu.memory_space<vmem>>, vector<8x4xf32>
      tpu.vector_store %arg10[%c0_189, %c0_190], %202 {strides = array<i32>} : memref<8x4xf32, #tpu.memory_space<vmem>>, vector<8x4xf32>,
    } else {
    }
    return
  }
  func.func @transform_0(%arg0: i32) -> (i32, i32, i32) {
    %c0_i32 = arith.constant 0 : i32
    %c0_i32_0 = arith.constant 0 : i32
    %c0_i32_1 = arith.constant 0 : i32
    return %arg0, %c0_i32, %c0_i32_0 : i32, i32, i32
  }
  func.func @transform_1(%arg0: i32) -> (i32, i32) {
    %c0_i32 = arith.constant 0 : i32
    %c0_i32_0 = arith.constant 0 : i32
    %c0_i32_1 = arith.constant 0 : i32
    return %c0_i32, %c0_i32_0 : i32, i32
  }
  func.func @transform_2(%arg0: i32) -> (i32, i32) {
    %c0_i32 = arith.constant 0 : i32
    %c0_i32_0 = arith.constant 0 : i32
    %c0_i32_1 = arith.constant 0 : i32
    return %c0_i32, %c0_i32_0 : i32, i32
  }
  func.func @transform_3(%arg0: i32) -> (i32, i32) {
    %c0_i32 = arith.constant 0 : i32
    %c0_i32_0 = arith.constant 0 : i32
    %c0_i32_1 = arith.constant 0 : i32
    return %c0_i32, %c0_i32_0 : i32, i32
  }
  func.func @transform_4(%arg0: i32) -> (i32, i32) {
    %c0_i32 = arith.constant 0 : i32
    %c0_i32_0 = arith.constant 0 : i32
    %c0_i32_1 = arith.constant 0 : i32
    return %c0_i32, %c0_i32_0 : i32, i32
  }
  func.func @transform_5(%arg0: i32) -> (i32, i32) {
    %c0_i32 = arith.constant 0 : i32
    %c0_i32_0 = arith.constant 0 : i32
    %c0_i32_1 = arith.constant 0 : i32
    return %c0_i32, %c0_i32_0 : i32, i32
  }
  func.func @transform_6(%arg0: i32) -> (i32, i32) {
    %c0_i32 = arith.constant 0 : i32
    %c0_i32_0 = arith.constant 0 : i32
    %c0_i32_1 = arith.constant 0 : i32
    return %c0_i32, %c0_i32_0 : i32, i32
  }
  func.func @transform_7(%arg0: i32) -> (i32, i32) {
    %c0_i32 = arith.constant 0 : i32
    %c0_i32_0 = arith.constant 0 : i32
    %c0_i32_1 = arith.constant 0 : i32
    return %c0_i32, %c0_i32_0 : i32, i32
  }
  func.func @transform_8(%arg0: i32) -> (i32, i32) {
    %c0_i32 = arith.constant 0 : i32
    %c0_i32_0 = arith.constant 0 : i32
    %c0_i32_1 = arith.constant 0 : i32
    return %c0_i32, %c0_i32_0 : i32, i32
  }
  func.func @transform_9(%arg0: i32) -> (i32, i32) {
    %c0_i32 = arith.constant 0 : i32
    %c0_i32_0 = arith.constant 0 : i32
    %c0_i32_1 = arith.constant 0 : i32
    return %c0_i32, %c0_i32_0 : i32, i32
  }
}

</mosaic_0001>

<bundles_post_ra>
// kernel: rnn_model_forward.1
= control target key start
LH: loop header
LB: loop body
LE: loop exit
PB: predicated region body
PF: predicated region fallthrough
CT: control target
= control target key end

     0   :  { %vm58_vm0 = vcmask 130048   ;;  %vm36_vm1 = vcmask 261120   ;;  %v2181_v3 = vmov 0.0   ;;  %vm2182_vm2 = vmmov 0   ;;  %s2608_s1 = inlined_call_operand.vmem [shape: f32[16,32], index: 1, kind: input, shape index: {}]   ;;  %s2609_s0 = inlined_call_operand.vmem [shape: f32[1,64,16], index: 0, kind: input, shape index: {}]   ;;  %s2610_s2 = inlined_call_operand.vmem [shape: f32[32,32], index: 2, kind: input, shape index: {}]   ;;  %s2611_s3 = inlined_call_operand.vmem [shape: f32[1,32], index: 3, kind: input, shape index: {}]   ;;  %s2612_s4 = inlined_call_operand.vmem [shape: f32[32,32], index: 4, kind: input, shape index: {}]   ;;  %s2613_s5 = inlined_call_operand.vmem [shape: f32[32,32], index: 5, kind: input, shape index: {}]   ;;  %s2614_s6 = inlined_call_operand.vmem [shape: f32[1,32], index: 6, kind: input, shape index: {}]   ;;  %s2615_s7 = inlined_call_operand.vmem [shape: f32[32,4], index: 7, kind: input, shape index: {}]   ;;  %s2616_s9 = inlined_call_operand.vmem [shape: f32[8,4], index: 9, kind: output, shape index: {}]   ;;  %s2617_s8 = inlined_call_operand.vmem [shape: f32[1,4], index: 8, kind: input, shape index: {}]  }
   0x1   :  { %v50_v0 = vld [vmem:[%s2608_s1 + $0x8] sm:$0xff]  ;;  %v49_v1 = vld [vmem:[%s2608_s1] sm:$0xff]  ;;  %1940 = vmatprep.subr.mxu1 %v2181_v3  ;;  %1948 = vmatprep.mubr.msk.f32.mxu1 %vm2182_vm2, %v2181_v3  ;;  %37 = vst.msk [vmem:[#allocation2] sm:$0xff] %vm36_vm1, %v2181_v3  ;;  %38 = vst.msk [vmem:[#allocation3] sm:$0xff] %vm36_vm1, %v2181_v3  ;;  %vm39_vm3 = vcmask 31744  }
   0x2   :  { %v41_v2 = vld [vmem:[%s2609_s0] sm:$0xff]  ;;  %1924 = vmatprep.subr.mxu0 %v50_v0  ;;  %v2253_v4 = vld [vmem:[%s2610_s2 + $0x18] sm:$0xff]  ;;  %v2258_v5 = vld [vmem:[%s2610_s2 + $0x10] sm:$0xff]  ;;  %40 = vst.msk [vmem:[%s2616_s9] sm:$0xff] %vm39_vm3, %v2181_v3 }
   0x3   :  { %1928 = vmatprep.mubr.msk.f32.mxu0 %vm58_vm0, %v41_v2  ;;  %1925 = vmatpush3.msra.mxu0 %v50_v0  ;;  %v42_v6 = vld [vmem:[%s2609_s0 + $0x8] sm:$0xff]  ;;  %v2276_v8 = vld [vmem:[%s2610_s2] sm:$0xff]  ;;  %v43_v21 = vld [vmem:[%s2609_s0 + $0x10] sm:$0xff] }
   0x4   :  { %1941 = vmatpush3.msra.mxu1 %v2253_v4  ;;  %1926 = vmatprep.subr.mxu0 %v49_v1  ;;  %v2268_v7 = vld [vmem:[%s2610_s2 + $0x8] sm:$0xff]  ;;  %v2305_v10 = vld [vmem:[%s2611_s3] ss:$0 sm:$0xff]  ;;  %v44_v22 = vld [vmem:[%s2609_s0 + $0x18] sm:$0xff] }
   0x5   :  { %1942 = vmatprep.subr.mxu1 %v2181_v3  ;;  %1927 = vmatpush3.msra.mxu0 %v49_v1  ;;  %v45_v23 = vld [vmem:[%s2609_s0 + $0x20] sm:$0xff]  ;;  %v46_v24 = vld [vmem:[%s2609_s0 + $0x28] sm:$0xff]  ;;  %v47_v25 = vld [vmem:[%s2609_s0 + $0x30] sm:$0xff] }
   0x6   :  { %1943 = vmatpush3.msra.mxu1 %v2258_v5  ;;  %1929 = vmatmul.mubr.msk.f32.vlgmr.msra.gmra.mxu0 %vm58_vm0, %v42_v6  ;;  %v48_v26 = vld [vmem:[%s2609_s0 + $0x38] sm:$0xff] }
   0x7   :  { %1944 = vmatprep.subr.mxu1 %v2181_v3  ;;  %1962 = vmatprep.subr.mxu0 %v2181_v3  ;;  %v886_v63 = vld [vmem:[%s2612_s4 + $0x18] sm:$0xff] }
   0x8   :  { %1945 = vmatpush3.msra.mxu1 %v2268_v7  ;;  %v198_v9 = vld [vmem:[#allocation2] sm:$0xff]  ;;  %1963 = vmatpush3.msra.mxu0 %v2253_v4 }
   0x9   :  { %1946 = vmatprep.subr.mxu1 %v2181_v3  ;;  %1964 = vmatprep.subr.mxu0 %v2181_v3 }
   0xa   :  { %1947 = vmatpush3.msra.mxu1 %v2276_v8  ;;  %1965 = vmatpush3.msra.mxu0 %v2258_v5 }
   0xb   :  { %1949 = vmatmul.mubr.msk.f32.vlgmr.msra.gmra.mxu1 %vm36_vm1, %v198_v9  ;;  %1951 = vmatprep.subr.mxu1 %v2181_v3  ;;  %v884_v9 = vld [vmem:[%s2612_s4 + $0x8] sm:$0xff] }
   0xc   :  { %1952 = vmatpush3.msra.mxu1 %v2253_v4  ;;  %1959 = vmatprep.mubr.msk.f32.mxu1 %vm2182_vm2, %v2181_v3 }
   0xd   :  { %1953 = vmatprep.subr.mxu1 %v2181_v3  ;;  %1966 = vmatprep.subr.mxu0 %v2181_v3 }
   0xe   :  { %1954 = vmatpush3.msra.mxu1 %v2258_v5  ;;  %1967 = vmatpush3.msra.mxu0 %v2268_v7 }
   0xf   :  { %1955 = vmatprep.subr.mxu1 %v2181_v3  ;;  %1968 = vmatprep.subr.mxu0 %v2181_v3 }
  0x10   :  { %1956 = vmatpush3.msra.mxu1 %v2268_v7  ;;  %1969 = vmatpush3.msra.mxu0 %v2276_v8 }
  0x11   :  { %1957 = vmatprep.subr.mxu1 %v2181_v3  ;;  %1984 = vmatprep.subr.mxu0 %v2181_v3 }
  0x12   :  { %1958 = vmatpush3.msra.mxu1 %v2276_v8  ;;  %1931 = vmatprep.mubr.msk.f32.mxu0 %vm58_vm0, %v43_v21 }
  0x13   :  { %1973 = vmatprep.subr.mxu1 %v2181_v3  ;;  %1932 = vmatmul.mubr.msk.f32.gmra.mxu0 %vm58_vm0, %v44_v22 }
  0x14   :  { %1934 = vmatprep.mubr.msk.f32.mxu0 %vm58_vm0, %v45_v23 }
  0x17   :  { %1935 = vmatmul.mubr.msk.f32.gmra.mxu0 %vm58_vm0, %v46_v24  ;;  %v2466_v24 = vld [vmem:[%s2614_s6] ss:$0 sm:$0xff] }
  0x18   :  { %1937 = vmatprep.mubr.msk.f32.mxu0 %vm58_vm0, %v47_v25 }
  0x1b   :  { %1938 = vmatmul.mubr.msk.f32.gmra.mxu0 %vm58_vm0, %v48_v26 }
  0x1c   :  { %1970 = vmatprep.mubr.msk.f32.mxu0 %vm2182_vm2, %v2181_v3 }
  0xc6   :  { %v1930_v11 = vpop.f32.mrf.mxu0 }
  0xc7   :  { %v155_v12 = vadd.f32 %v1930_v11, %v2305_v10 }
  0xc8   :  { %v149_v13 = vpop.f32.mrf.mxu0 }
  0xc9   :  { %190 = vst.msk [vmem:[#allocation4 + $0x8] sm:$0xff] %vm36_vm1, %v155_v12  ;;  %v150_v14 = vadd.f32 %v2305_v10, %v149_v13 }
  0xcb   :  { %v272_v15 = vpop.f32.mrf.mxu1  ;;  %189 = vst.msk [vmem:[#allocation4] sm:$0xff] %vm36_vm1, %v150_v14 }
  0xcd   :  { %v1950_v16 = vpop.f32.mrf.mxu1 }
  0xce   :  { %v2438_v16 = vld [vmem:[%s2613_s5 + $0x18] sm:$0xff] }
  0xd0   :  { %v281_v27 = vld [vmem:[#allocation4 + $0x8] sm:$0xff] }
  0xd2   :  { %v197_v17 = vld [vmem:[#allocation4] sm:$0xff] }
  0xd3   :  { %v276_v18 = vadd.f32 %v272_v15, %v197_v17  ;;  %v1933_v33 = vpop.f32.mrf.mxu0  ;;  %v2444_v17 = vld [vmem:[%s2613_s5 + $0x10] sm:$0xff] }
  0xd4   :  { %v165_v34 = vadd.f32 %v1933_v33, %v2305_v10 }
  0xd5   :  { %2149 = vtanh.f32 %v276_v18  ;;  %v159_v35 = vpop.f32.mrf.mxu0  ;;  %v2451_v18 = vld [vmem:[%s2613_s5 + $0x8] sm:$0xff] }
  0xd6   :  { %192 = vst.msk [vmem:[#allocation4 + $0x18] sm:$0xff] %vm36_vm1, %v165_v34  ;;  %v160_v36 = vadd.f32 %v2305_v10, %v159_v35 }
  0xd7   :  { %v1936_v37 = vpop.f32.mrf.mxu0 }
  0xd8   :  { %191 = vst.msk [vmem:[#allocation4 + $0x10] sm:$0xff] %vm36_vm1, %v160_v36  ;;  %v175_v38 = vadd.f32 %v1936_v37, %v2305_v10 }
  0xd9   :  { %v169_v39 = vpop.f32.mrf.mxu0 }
  0xda   :  { %194 = vst.msk [vmem:[#allocation4 + $0x28] sm:$0xff] %vm36_vm1, %v175_v38  ;;  %v170_v40 = vadd.f32 %v2305_v10, %v169_v39 }
  0xdb   :  { %v1939_v41 = vpop.f32.mrf.mxu0 }
  0xdc   :  { %193 = vst.msk [vmem:[#allocation4 + $0x20] sm:$0xff] %vm36_vm1, %v170_v40  ;;  %v185_v42 = vadd.f32 %v1939_v41, %v2305_v10  ;;  %v1032_v40 = vld [vmem:[#allocation3] sm:$0xff] }
  0xdd   :  { %v179_v43 = vpop.f32.mrf.mxu0  ;;  %v451_v51 = vld [vmem:[#allocation4 + $0x18] sm:$0xff] }
  0xde   :  { %196 = vst.msk [vmem:[#allocation4 + $0x38] sm:$0xff] %vm36_vm1, %v185_v42  ;;  %v180_v44 = vadd.f32 %v2305_v10, %v179_v43  ;;  %v883_v10 = vld [vmem:[%s2612_s4] sm:$0xff] }
  0xdf   :  { %v366_v45 = vld [vmem:[#allocation4 + $0x10] sm:$0xff] }
  0xe0   :  { %195 = vst.msk [vmem:[#allocation4 + $0x30] sm:$0xff] %vm36_vm1, %v180_v44 }
  0xe1   :  { %v621_v0 = vld [vmem:[#allocation4 + $0x28] sm:$0xff] }
  0xe2   :  { %v2150_v19 = vpop.eup %2149 }
  0xe3   :  { %279 = vst.msk [vmem:[#allocation5] sm:$0xff] %vm36_vm1, %v2150_v19  ;;  %278 = vst.msk [vmem:[#allocation2] sm:$0xff] %vm36_vm1, %v2150_v19  ;;  %v536_v57 = vld [vmem:[#allocation4 + $0x20] sm:$0xff]  ;;  %v2458_v19 = vld [vmem:[%s2613_s5] sm:$0xff] }
  0xe5   :  { %v791_v41 = vld [vmem:[#allocation4 + $0x38] sm:$0xff] }
  0xea   :  { %v282_v20 = vld [vmem:[#allocation2] sm:$0xff] }
  0xeb   :  { %1960 = vmatmul.mubr.msk.f32.vlgmr.msra.gmra.mxu1 %vm36_vm1, %v282_v20  ;;  %v706_v20 = vld [vmem:[#allocation4 + $0x30] sm:$0xff] }
  0xec   :  { %1974 = vmatpush3.msra.mxu1 %v2253_v4  ;;  %1981 = vmatprep.mubr.msk.f32.mxu1 %vm2182_vm2, %v2181_v3 }
  0xed   :  { %1975 = vmatprep.subr.mxu1 %v2181_v3 }
  0xee   :  { %1976 = vmatpush3.msra.mxu1 %v2258_v5 }
  0xef   :  { %1977 = vmatprep.subr.mxu1 %v2181_v3 }
  0xf0   :  { %1978 = vmatpush3.msra.mxu1 %v2268_v7 }
  0xf1   :  { %1979 = vmatprep.subr.mxu1 %v2181_v3 }
  0xf2   :  { %1980 = vmatpush3.msra.mxu1 %v2276_v8 }
  0xf3   :  { %1995 = vmatprep.subr.mxu1 %v2181_v3 }
 0x1ab   :  { %v356_v28 = vpop.f32.mrf.mxu1 }
 0x1ac   :  { %v360_v29 = vadd.f32 %v356_v28, %v281_v27 }
 0x1ad   :  { %v1961_v30 = vpop.f32.mrf.mxu1 }
 0x1ae   :  { %2151 = vtanh.f32 %v360_v29 }
 0x1bb   :  { %v2152_v31 = vpop.eup %2151 }
 0x1bc   :  { %364 = vst.msk [vmem:[#allocation5 + $0x8] sm:$0xff] %vm36_vm1, %v2152_v31  ;;  %362 = vst.msk [vmem:[#allocation2] sm:$0xff] %vm36_vm1, %v2152_v31 }
 0x1c3   :  { %v367_v32 = vld [vmem:[#allocation2] sm:$0xff]  ;;  %v876_v11 = vld [vmem:[#allocation5 + $0x8] sm:$0xff] }
 0x1c4   :  { %1971 = vmatmul.mubr.msk.f32.vlgmr.msra.gmra.mxu0 %vm36_vm1, %v367_v32 }
 0x1c5   :  { %1985 = vmatpush3.msra.mxu0 %v2253_v4  ;;  %1992 = vmatprep.mubr.msk.f32.mxu0 %vm2182_vm2, %v2181_v3 }
 0x1c6   :  { %1986 = vmatprep.subr.mxu0 %v2181_v3 }
 0x1c7   :  { %1987 = vmatpush3.msra.mxu0 %v2258_v5 }
 0x1c8   :  { %1988 = vmatprep.subr.mxu0 %v2181_v3 }
 0x1c9   :  { %1989 = vmatpush3.msra.mxu0 %v2268_v7 }
 0x1ca   :  { %1990 = vmatprep.subr.mxu0 %v2181_v3 }
 0x1cb   :  { %1991 = vmatpush3.msra.mxu0 %v2276_v8 }
 0x1cc   :  { %2006 = vmatprep.subr.mxu0 %v2181_v3 }
 0x284   :  { %v441_v46 = vpop.f32.mrf.mxu0 }
 0x285   :  { %v445_v47 = vadd.f32 %v441_v46, %v366_v45 }
 0x286   :  { %v1972_v48 = vpop.f32.mrf.mxu0 }
 0x287   :  { %2153 = vtanh.f32 %v445_v47 }
 0x294   :  { %v2154_v49 = vpop.eup %2153 }
 0x295   :  { %449 = vst.msk [vmem:[#allocation5 + $0x10] sm:$0xff] %vm36_vm1, %v2154_v49  ;;  %447 = vst.msk [vmem:[#allocation2] sm:$0xff] %vm36_vm1, %v2154_v49 }
 0x29c   :  { %v452_v50 = vld [vmem:[#allocation2] sm:$0xff] }
 0x29d   :  { %1982 = vmatmul.mubr.msk.f32.vlgmr.msra.gmra.mxu1 %vm36_vm1, %v452_v50  ;;  %v877_v12 = vld [vmem:[#allocation5 + $0x10] sm:$0xff] }
 0x29e   :  { %1996 = vmatpush3.msra.mxu1 %v2253_v4  ;;  %2003 = vmatprep.mubr.msk.f32.mxu1 %vm2182_vm2, %v2181_v3 }
 0x29f   :  { %1997 = vmatprep.subr.mxu1 %v2181_v3 }
 0x2a0   :  { %1998 = vmatpush3.msra.mxu1 %v2258_v5 }
 0x2a1   :  { %1999 = vmatprep.subr.mxu1 %v2181_v3 }
 0x2a2   :  { %2000 = vmatpush3.msra.mxu1 %v2268_v7 }
 0x2a3   :  { %2001 = vmatprep.subr.mxu1 %v2181_v3 }
 0x2a4   :  { %2002 = vmatpush3.msra.mxu1 %v2276_v8 }
 0x2a5   :  { %2017 = vmatprep.subr.mxu1 %v2181_v3 }
 0x35d   :  { %v526_v52 = vpop.f32.mrf.mxu1 }
 0x35e   :  { %v530_v53 = vadd.f32 %v526_v52, %v451_v51 }
 0x35f   :  { %v1983_v54 = vpop.f32.mrf.mxu1 }
 0x360   :  { %2155 = vtanh.f32 %v530_v53 }
 0x36d   :  { %v2156_v55 = vpop.eup %2155 }
 0x36e   :  { %534 = vst.msk [vmem:[#allocation5 + $0x18] sm:$0xff] %vm36_vm1, %v2156_v55  ;;  %532 = vst.msk [vmem:[#allocation2] sm:$0xff] %vm36_vm1, %v2156_v55 }
 0x375   :  { %v537_v56 = vld [vmem:[#allocation2] sm:$0xff]  ;;  %v878_v13 = vld [vmem:[#allocation5 + $0x18] sm:$0xff] }
 0x376   :  { %1993 = vmatmul.mubr.msk.f32.vlgmr.msra.gmra.mxu0 %vm36_vm1, %v537_v56 }
 0x377   :  { %2007 = vmatpush3.msra.mxu0 %v2253_v4  ;;  %2014 = vmatprep.mubr.msk.f32.mxu0 %vm2182_vm2, %v2181_v3 }
 0x378   :  { %2008 = vmatprep.subr.mxu0 %v2181_v3 }
 0x379   :  { %2009 = vmatpush3.msra.mxu0 %v2258_v5 }
 0x37a   :  { %2010 = vmatprep.subr.mxu0 %v2181_v3 }
 0x37b   :  { %2011 = vmatpush3.msra.mxu0 %v2268_v7 }
 0x37c   :  { %2012 = vmatprep.subr.mxu0 %v2181_v3 }
 0x37d   :  { %2013 = vmatpush3.msra.mxu0 %v2276_v8 }
 0x37e   :  { %2028 = vmatprep.subr.mxu0 %v886_v63 }
 0x436   :  { %v611_v58 = vpop.f32.mrf.mxu0 }
 0x437   :  { %v615_v59 = vadd.f32 %v611_v58, %v536_v57 }
 0x438   :  { %v1994_v60 = vpop.f32.mrf.mxu0 }
 0x439   :  { %2157 = vtanh.f32 %v615_v59 }
 0x446   :  { %v2158_v61 = vpop.eup %2157 }
 0x447   :  { %619 = vst.msk [vmem:[#allocation5 + $0x20] sm:$0xff] %vm36_vm1, %v2158_v61  ;;  %617 = vst.msk [vmem:[#allocation2] sm:$0xff] %vm36_vm1, %v2158_v61 }
 0x44e   :  { %v622_v62 = vld [vmem:[#allocation2] sm:$0xff]  ;;  %v879_v14 = vld [vmem:[#allocation5 + $0x20] sm:$0xff] }
 0x44f   :  { %2004 = vmatmul.mubr.msk.f32.vlgmr.msra.gmra.mxu1 %vm36_vm1, %v622_v62 }
 0x450   :  { %2018 = vmatpush3.msra.mxu1 %v2253_v4  ;;  %2025 = vmatprep.mubr.msk.f32.mxu1 %vm2182_vm2, %v2181_v3 }
 0x451   :  { %2019 = vmatprep.subr.mxu1 %v2181_v3 }
 0x452   :  { %2020 = vmatpush3.msra.mxu1 %v2258_v5 }
 0x453   :  { %2021 = vmatprep.subr.mxu1 %v2181_v3 }
 0x454   :  { %2022 = vmatpush3.msra.mxu1 %v2268_v7  ;;  %v885_v7 = vld [vmem:[%s2612_s4 + $0x10] sm:$0xff] }
 0x455   :  { %2023 = vmatprep.subr.mxu1 %v2181_v3 }
 0x456   :  { %2024 = vmatpush3.msra.mxu1 %v2276_v8  ;;  %v875_v8 = vld [vmem:[#allocation5] sm:$0xff] }
 0x457   :  { %2048 = vmatprep.subr.mxu1 %v2181_v3 }
 0x50f   :  { %v696_v1 = vpop.f32.mrf.mxu1 }
 0x510   :  { %v700_v2 = vadd.f32 %v696_v1, %v621_v0 }
 0x511   :  { %v2005_v4 = vpop.f32.mrf.mxu1 }
 0x512   :  { %2159 = vtanh.f32 %v700_v2 }
 0x51f   :  { %v2160_v5 = vpop.eup %2159 }
 0x520   :  { %704 = vst.msk [vmem:[#allocation5 + $0x28] sm:$0xff] %vm36_vm1, %v2160_v5  ;;  %702 = vst.msk [vmem:[#allocation2] sm:$0xff] %vm36_vm1, %v2160_v5 }
 0x527   :  { %v707_v6 = vld [vmem:[#allocation2] sm:$0xff]  ;;  %v880_v15 = vld [vmem:[#allocation5 + $0x28] sm:$0xff] }
 0x528   :  { %2015 = vmatmul.mubr.msk.f32.vlgmr.msra.gmra.mxu0 %vm36_vm1, %v707_v6 }
 0x529   :  { %2029 = vmatpush3.msra.mxu0 %v886_v63  ;;  %2036 = vmatprep.mubr.msk.f32.mxu0 %vm36_vm1, %v875_v8 }
 0x52a   :  { %2030 = vmatprep.subr.mxu0 %v885_v7 }
 0x52b   :  { %2031 = vmatpush3.msra.mxu0 %v885_v7 }
 0x52c   :  { %2032 = vmatprep.subr.mxu0 %v884_v9 }
 0x52d   :  { %2033 = vmatpush3.msra.mxu0 %v884_v9 }
 0x52e   :  { %2034 = vmatprep.subr.mxu0 %v883_v10 }
 0x52f   :  { %2035 = vmatpush3.msra.mxu0 %v883_v10 }
 0x530   :  { %2037 = vmatmul.mubr.msk.f32.vlgmr.msra.gmra.mxu0 %vm36_vm1, %v876_v11  ;;  %2070 = vmatprep.subr.mxu0 %v2181_v3 }
 0x531   :  { %2039 = vmatprep.mubr.msk.f32.mxu0 %vm36_vm1, %v877_v12  ;;  %2071 = vmatpush3.msra.mxu0 %v2438_v16 }
 0x532   :  { %2072 = vmatprep.subr.mxu0 %v2181_v3 }
 0x533   :  { %2073 = vmatpush3.msra.mxu0 %v2444_v17 }
 0x534   :  { %2040 = vmatmul.mubr.msk.f32.gmra.mxu0 %vm36_vm1, %v878_v13  ;;  %2074 = vmatprep.subr.mxu0 %v2181_v3 }
 0x535   :  { %2042 = vmatprep.mubr.msk.f32.mxu0 %vm36_vm1, %v879_v14  ;;  %2075 = vmatpush3.msra.mxu0 %v2451_v18 }
 0x536   :  { %2076 = vmatprep.subr.mxu0 %v2181_v3 }
 0x537   :  { %2077 = vmatpush3.msra.mxu0 %v2458_v19 }
 0x538   :  { %2043 = vmatmul.mubr.msk.f32.gmra.mxu0 %vm36_vm1, %v880_v15  ;;  %2092 = vmatprep.subr.mxu0 %v2181_v3 }
 0x5e8   :  { %v781_v21 = vpop.f32.mrf.mxu0 }
 0x5e9   :  { %v785_v22 = vadd.f32 %v781_v21, %v706_v20 }
 0x5ea   :  { %v2016_v23 = vpop.f32.mrf.mxu0 }
 0x5eb   :  { %2161 = vtanh.f32 %v785_v22 }
 0x5f0   :  { %v2038_v25 = vpop.f32.mrf.mxu0 }
 0x5f1   :  { %v990_v26 = vadd.f32 %v2038_v25, %v2466_v24 }
 0x5f2   :  { %v984_v27 = vpop.f32.mrf.mxu0 }
 0x5f3   :  { %1024 = vst.msk [vmem:[#allocation4 + $0x8] sm:$0xff] %vm36_vm1, %v990_v26  ;;  %v985_v28 = vadd.f32 %v2466_v24, %v984_v27 }
 0x5f4   :  { %v2041_v29 = vpop.f32.mrf.mxu0 }
 0x5f5   :  { %1023 = vst.msk [vmem:[#allocation4] sm:$0xff] %vm36_vm1, %v985_v28  ;;  %v1000_v30 = vadd.f32 %v2041_v29, %v2466_v24 }
 0x5f6   :  { %v994_v31 = vpop.f32.mrf.mxu0 }
 0x5f7   :  { %1026 = vst.msk [vmem:[#allocation4 + $0x18] sm:$0xff] %vm36_vm1, %v1000_v30  ;;  %v995_v32 = vadd.f32 %v2466_v24, %v994_v31  ;;  %v1694_v30 = vld [vmem:[%s2615_s7 + $0x18] sm:$0xff]  ;;  %v1693_v31 = vld [vmem:[%s2615_s7 + $0x10] sm:$0xff] }
 0x5f8   :  { %v2162_v33 = vpop.eup %2161  ;;  %v2044_v34 = vpop.f32.mrf.mxu0 }
 0x5f9   :  { %789 = vst.msk [vmem:[#allocation5 + $0x30] sm:$0xff] %vm36_vm1, %v2162_v33  ;;  %787 = vst.msk [vmem:[#allocation2] sm:$0xff] %vm36_vm1, %v2162_v33  ;;  %v1010_v35 = vadd.f32 %v2044_v34, %v2466_v24  ;;  %v1691_v33 = vld [vmem:[%s2615_s7] sm:$0xff] }
 0x5fa   :  { %1025 = vst.msk [vmem:[#allocation4 + $0x10] sm:$0xff] %vm36_vm1, %v995_v32  ;;  %v1004_v36 = vpop.f32.mrf.mxu0  ;;  %v1113_v57 = vld [vmem:[#allocation4 + $0x8] sm:$0xff]  ;;  %v1692_v32 = vld [vmem:[%s2615_s7 + $0x8] sm:$0xff] }
 0x5fb   :  { %1028 = vst.msk [vmem:[#allocation4 + $0x28] sm:$0xff] %vm36_vm1, %v1010_v35  ;;  %v1005_v37 = vadd.f32 %v2466_v24, %v1004_v36 }
 0x5fc   :  { %v1031_v45 = vld [vmem:[#allocation4] sm:$0xff] }
 0x5fd   :  { %1027 = vst.msk [vmem:[#allocation4 + $0x20] sm:$0xff] %vm36_vm1, %v1005_v37 }
 0x5fe   :  { %v1277_v6 = vld [vmem:[#allocation4 + $0x18] sm:$0xff] }
 0x600   :  { %v792_v38 = vld [vmem:[#allocation2] sm:$0xff] }
 0x601   :  { %v881_v39 = vld [vmem:[#allocation5 + $0x30] sm:$0xff]  ;;  %2026 = vmatmul.mubr.msk.f32.vlgmr.msra.gmra.mxu1 %vm36_vm1, %v792_v38 }
 0x602   :  { %2045 = vmatprep.mubr.msk.f32.mxu0 %vm36_vm1, %v881_v39  ;;  %2049 = vmatpush3.msra.mxu1 %v2438_v16  ;;  %v1195_v63 = vld [vmem:[#allocation4 + $0x10] sm:$0xff]  ;;  %v1441_v22 = vld [vmem:[#allocation4 + $0x28] sm:$0xff] }
 0x603   :  { %2056 = vmatprep.mubr.msk.f32.mxu1 %vm2182_vm2, %v2181_v3  ;;  %2050 = vmatprep.subr.mxu1 %v2181_v3 }
 0x604   :  { %2051 = vmatpush3.msra.mxu1 %v2444_v17  ;;  %v1359_v12 = vld [vmem:[#allocation4 + $0x20] sm:$0xff] }
 0x605   :  { %2052 = vmatprep.subr.mxu1 %v2181_v3 }
 0x606   :  { %2053 = vmatpush3.msra.mxu1 %v2451_v18 }
 0x607   :  { %2054 = vmatprep.subr.mxu1 %v2181_v3 }
 0x608   :  { %2055 = vmatpush3.msra.mxu1 %v2458_v19 }
 0x609   :  { %2057 = vmatmul.mubr.msk.f32.vlgmr.msra.gmra.mxu1 %vm36_vm1, %v1032_v40  ;;  %2059 = vmatprep.subr.mxu1 %v2181_v3  ;;  %v1815_v40 = vld [vmem:[%s2617_s8] ss:$0 sm:$0xff] }
 0x60a   :  { %2060 = vmatpush3.msra.mxu1 %v2438_v16  ;;  %2067 = vmatprep.mubr.msk.f32.mxu1 %vm2182_vm2, %v2181_v3 }
 0x60b   :  { %2061 = vmatprep.subr.mxu1 %v2181_v3 }
 0x60c   :  { %2062 = vmatpush3.msra.mxu1 %v2444_v17 }
 0x60d   :  { %2063 = vmatprep.subr.mxu1 %v2181_v3 }
 0x60e   :  { %2064 = vmatpush3.msra.mxu1 %v2451_v18 }
 0x60f   :  { %2065 = vmatprep.subr.mxu1 %v2181_v3 }
 0x610   :  { %2066 = vmatpush3.msra.mxu1 %v2458_v19 }
 0x611   :  { %2081 = vmatprep.subr.mxu1 %v2181_v3 }
 0x6c1   :  { %v866_v42 = vpop.f32.mrf.mxu1 }
 0x6c2   :  { %v870_v43 = vadd.f32 %v866_v42, %v791_v41 }
 0x6c3   :  { %v2027_v44 = vpop.f32.mrf.mxu1 }
 0x6c4   :  { %2163 = vtanh.f32 %v870_v43 }
 0x6c9   :  { %v1106_v46 = vpop.f32.mrf.mxu1 }
 0x6ca   :  { %v1110_v47 = vadd.f32 %v1106_v46, %v1031_v45 }
 0x6cb   :  { %v2058_v48 = vpop.f32.mrf.mxu1 }
 0x6cc   :  { %2165 = vtanh.f32 %v1110_v47 }
 0x6d1   :  { %v2164_v49 = vpop.eup %2163 }
 0x6d2   :  { %872 = vst.msk [vmem:[#allocation2] sm:$0xff] %vm36_vm1, %v2164_v49  ;;  %874 = vst.msk [vmem:[#allocation5 + $0x38] sm:$0xff] %vm36_vm1, %v2164_v49 }
 0x6d9   :  { %v2166_v50 = vpop.eup %2165  ;;  %v882_v51 = vld [vmem:[#allocation5 + $0x38] sm:$0xff] }
 0x6da   :  { %1112 = vst.msk [vmem:[#allocation3] sm:$0xff] %vm36_vm1, %v2166_v50  ;;  %2046 = vmatmul.mubr.msk.f32.gmra.mxu0 %vm36_vm1, %v882_v51 }
 0x6db   :  { %2078 = vmatprep.mubr.msk.f32.mxu0 %vm2182_vm2, %v2181_v3 }
 0x6e1   :  { %v1114_v52 = vld [vmem:[#allocation3] sm:$0xff] }
 0x6e2   :  { %2068 = vmatmul.mubr.msk.f32.vlgmr.msra.gmra.mxu1 %vm36_vm1, %v1114_v52 }
 0x6e3   :  { %2082 = vmatpush3.msra.mxu1 %v2438_v16  ;;  %2089 = vmatprep.mubr.msk.f32.mxu1 %vm2182_vm2, %v2181_v3 }
 0x6e4   :  { %2083 = vmatprep.subr.mxu1 %v2181_v3 }
 0x6e5   :  { %2084 = vmatpush3.msra.mxu1 %v2444_v17 }
 0x6e6   :  { %2085 = vmatprep.subr.mxu1 %v2181_v3 }
 0x6e7   :  { %2086 = vmatpush3.msra.mxu1 %v2451_v18 }
 0x6e8   :  { %2087 = vmatprep.subr.mxu1 %v2181_v3 }
 0x6e9   :  { %2088 = vmatpush3.msra.mxu1 %v2458_v19 }
 0x6ea   :  { %2103 = vmatprep.subr.mxu1 %v2181_v3 }
 0x79a   :  { %v2047_v53 = vpop.f32.mrf.mxu0 }
 0x79b   :  { %v1020_v54 = vadd.f32 %v2047_v53, %v2466_v24 }
 0x79c   :  { %v1014_v55 = vpop.f32.mrf.mxu0 }
 0x79d   :  { %1030 = vst.msk [vmem:[#allocation4 + $0x38] sm:$0xff] %vm36_vm1, %v1020_v54  ;;  %v1015_v56 = vadd.f32 %v2466_v24, %v1014_v55 }
 0x79f   :  { %1029 = vst.msk [vmem:[#allocation4 + $0x30] sm:$0xff] %vm36_vm1, %v1015_v56 }
 0x7a2   :  { %v1188_v58 = vpop.f32.mrf.mxu1 }
 0x7a3   :  { %v1192_v59 = vadd.f32 %v1188_v58, %v1113_v57 }
 0x7a4   :  { %v2069_v60 = vpop.f32.mrf.mxu1  ;;  %v1605_v34 = vld [vmem:[#allocation4 + $0x38] sm:$0xff] }
 0x7a5   :  { %2167 = vtanh.f32 %v1192_v59 }
 0x7b2   :  { %v2168_v61 = vpop.eup %2167 }
 0x7b3   :  { %1194 = vst.msk [vmem:[#allocation3] sm:$0xff] %vm36_vm1, %v2168_v61 }
 0x7ba   :  { %v1196_v62 = vld [vmem:[#allocation3] sm:$0xff] }
 0x7bb   :  { %2079 = vmatmul.mubr.msk.f32.vlgmr.msra.gmra.mxu0 %vm36_vm1, %v1196_v62 }
 0x7bc   :  { %2093 = vmatpush3.msra.mxu0 %v2438_v16  ;;  %2100 = vmatprep.mubr.msk.f32.mxu0 %vm2182_vm2, %v2181_v3 }
 0x7bd   :  { %2094 = vmatprep.subr.mxu0 %v2181_v3 }
 0x7be   :  { %2095 = vmatpush3.msra.mxu0 %v2444_v17 }
 0x7bf   :  { %2096 = vmatprep.subr.mxu0 %v2181_v3 }
 0x7c0   :  { %2097 = vmatpush3.msra.mxu0 %v2451_v18 }
 0x7c1   :  { %2098 = vmatprep.subr.mxu0 %v2181_v3 }
 0x7c2   :  { %2099 = vmatpush3.msra.mxu0 %v2458_v19 }
 0x7c3   :  { %2114 = vmatprep.subr.mxu0 %v2181_v3 }
 0x87b   :  { %v1270_v0 = vpop.f32.mrf.mxu0 }
 0x87c   :  { %v1274_v1 = vadd.f32 %v1270_v0, %v1195_v63 }
 0x87d   :  { %v2080_v2 = vpop.f32.mrf.mxu0 }
 0x87e   :  { %2169 = vtanh.f32 %v1274_v1 }
 0x88b   :  { %v2170_v4 = vpop.eup %2169 }
 0x88c   :  { %1276 = vst.msk [vmem:[#allocation3] sm:$0xff] %vm36_vm1, %v2170_v4 }
 0x893   :  { %v1278_v5 = vld [vmem:[#allocation3] sm:$0xff] }
 0x894   :  { %2090 = vmatmul.mubr.msk.f32.vlgmr.msra.gmra.mxu1 %vm36_vm1, %v1278_v5 }
 0x895   :  { %2104 = vmatpush3.msra.mxu1 %v2438_v16  ;;  %2111 = vmatprep.mubr.msk.f32.mxu1 %vm2182_vm2, %v2181_v3 }
 0x896   :  { %2105 = vmatprep.subr.mxu1 %v2181_v3 }
 0x897   :  { %2106 = vmatpush3.msra.mxu1 %v2444_v17 }
 0x898   :  { %2107 = vmatprep.subr.mxu1 %v2181_v3 }
 0x899   :  { %2108 = vmatpush3.msra.mxu1 %v2451_v18 }
 0x89a   :  { %2109 = vmatprep.subr.mxu1 %v2181_v3 }
 0x89b   :  { %2110 = vmatpush3.msra.mxu1 %v2458_v19 }
 0x89c   :  { %2125 = vmatprep.subr.mxu1 %v2181_v3 }
 0x954   :  { %v1352_v7 = vpop.f32.mrf.mxu1 }
 0x955   :  { %v1356_v8 = vadd.f32 %v1352_v7, %v1277_v6 }
 0x956   :  { %v2091_v9 = vpop.f32.mrf.mxu1 }
 0x957   :  { %2171 = vtanh.f32 %v1356_v8 }
 0x964   :  { %v2172_v10 = vpop.eup %2171 }
 0x965   :  { %1358 = vst.msk [vmem:[#allocation3] sm:$0xff] %vm36_vm1, %v2172_v10 }
 0x96c   :  { %v1360_v11 = vld [vmem:[#allocation3] sm:$0xff] }
 0x96d   :  { %2101 = vmatmul.mubr.msk.f32.vlgmr.msra.gmra.mxu0 %vm36_vm1, %v1360_v11 }
 0x96e   :  { %2115 = vmatpush3.msra.mxu0 %v2438_v16  ;;  %2122 = vmatprep.mubr.msk.f32.mxu0 %vm2182_vm2, %v2181_v3 }
 0x96f   :  { %2116 = vmatprep.subr.mxu0 %v2181_v3 }
 0x970   :  { %2117 = vmatpush3.msra.mxu0 %v2444_v17 }
 0x971   :  { %2118 = vmatprep.subr.mxu0 %v2181_v3 }
 0x972   :  { %2119 = vmatpush3.msra.mxu0 %v2451_v18 }
 0x973   :  { %2120 = vmatprep.subr.mxu0 %v2181_v3 }
 0x974   :  { %2121 = vmatpush3.msra.mxu0 %v2458_v19 }
 0x975   :  { %2136 = vmatprep.subr.mxu0 %v2181_v3 }
 0xa2d   :  { %v1434_v13 = vpop.f32.mrf.mxu0 }
 0xa2e   :  { %v1438_v14 = vadd.f32 %v1434_v13, %v1359_v12 }
 0xa2f   :  { %v2102_v15 = vpop.f32.mrf.mxu0 }
 0xa30   :  { %2173 = vtanh.f32 %v1438_v14 }
 0xa3d   :  { %v2174_v20 = vpop.eup %2173 }
 0xa3e   :  { %1440 = vst.msk [vmem:[#allocation3] sm:$0xff] %vm36_vm1, %v2174_v20 }
 0xa45   :  { %v1442_v21 = vld [vmem:[#allocation3] sm:$0xff] }
 0xa46   :  { %2112 = vmatmul.mubr.msk.f32.vlgmr.msra.gmra.mxu1 %vm36_vm1, %v1442_v21 }
 0xa47   :  { %2126 = vmatpush3.msra.mxu1 %v2438_v16  ;;  %2133 = vmatprep.mubr.msk.f32.mxu1 %vm2182_vm2, %v2181_v3 }
 0xa48   :  { %2127 = vmatprep.subr.mxu1 %v2181_v3 }
 0xa49   :  { %2128 = vmatpush3.msra.mxu1 %v2444_v17  ;;  %v1523_v17 = vld [vmem:[#allocation4 + $0x30] sm:$0xff] }
 0xa4a   :  { %2129 = vmatprep.subr.mxu1 %v2181_v3 }
 0xa4b   :  { %2130 = vmatpush3.msra.mxu1 %v2451_v18 }
 0xa4c   :  { %2131 = vmatprep.subr.mxu1 %v2181_v3 }
 0xa4d   :  { %2132 = vmatpush3.msra.mxu1 %v2458_v19 }
 0xb06   :  { %v1516_v23 = vpop.f32.mrf.mxu1 }
 0xb07   :  { %v1520_v24 = vadd.f32 %v1516_v23, %v1441_v22 }
 0xb08   :  { %v2113_v25 = vpop.f32.mrf.mxu1 }
 0xb09   :  { %2175 = vtanh.f32 %v1520_v24 }
 0xb16   :  { %v2176_v16 = vpop.eup %2175 }
 0xb17   :  { %1522 = vst.msk [vmem:[#allocation3] sm:$0xff] %vm36_vm1, %v2176_v16 }
 0xb1e   :  { %v1524_v26 = vld [vmem:[#allocation3] sm:$0xff] }
 0xb1f   :  { %2123 = vmatmul.mubr.msk.f32.vlgmr.msra.gmra.mxu0 %vm36_vm1, %v1524_v26 }
 0xb20   :  { %2144 = vmatprep.mubr.msk.f32.mxu0 %vm2182_vm2, %v2181_v3  ;;  %2137 = vmatpush3.msra.mxu0 %v1694_v30 }
 0xb21   :  { %2138 = vmatprep.subr.mxu0 %v2181_v3 }
 0xb22   :  { %2139 = vmatpush3.msra.mxu0 %v1693_v31 }
 0xb23   :  { %2140 = vmatprep.subr.mxu0 %v2181_v3 }
 0xb24   :  { %2141 = vmatpush3.msra.mxu0 %v1692_v32 }
 0xb25   :  { %2142 = vmatprep.subr.mxu0 %v2181_v3 }
 0xb26   :  { %2143 = vmatpush3.msra.mxu0 %v1691_v33 }
 0xbdf   :  { %v1598_v18 = vpop.f32.mrf.mxu0 }
 0xbe0   :  { %v1602_v27 = vadd.f32 %v1598_v18, %v1523_v17 }
 0xbe1   :  { %v2124_v28 = vpop.f32.mrf.mxu0 }
 0xbe2   :  { %2177 = vtanh.f32 %v1602_v27 }
 0xbef   :  { %v2178_v19 = vpop.eup %2177 }
 0xbf0   :  { %1604 = vst.msk [vmem:[#allocation3] sm:$0xff] %vm36_vm1, %v2178_v19 }
 0xbf7   :  { %v1606_v29 = vld [vmem:[#allocation3] sm:$0xff] }
 0xbf8   :  { %2134 = vmatmul.mubr.msk.f32.vlgmr.msra.gmra.mxu1 %vm36_vm1, %v1606_v29 }
 0xcb8   :  { %v1680_v35 = vpop.f32.mrf.mxu1 }
 0xcb9   :  { %v1684_v36 = vadd.f32 %v1680_v35, %v1605_v34 }
 0xcba   :  { %v2135_v37 = vpop.f32.mrf.mxu1 }
 0xcbb   :  { %2179 = vtanh.f32 %v1684_v36 }
 0xcc8   :  { %v2180_v38 = vpop.eup %2179 }
 0xcc9   :  { %1686 = vst.msk [vmem:[#allocation3] sm:$0xff] %vm36_vm1, %v2180_v38 }
 0xcd0   :  { %v1690_v39 = vld [vmem:[#allocation3] sm:$0xff] }
 0xcd1   :  { %2145 = vmatmul.mubr.msk.f32.vlgmr.msra.gmra.mxu0 %vm36_vm1, %v1690_v39 }
 0xd91   :  { %v1771_v41 = vpop.f32.mrf.mxu0 }
 0xd92   :  { %v1772_v42 = vadd.f32 %v1815_v40, %v1771_v41 }
 0xd93   :  { %v2146_v43 = vpop.f32.mrf.mxu0 }
 0xd94   :  { %1776 = vst.msk [vmem:[%s2616_s9] sm:$0xff] %vm39_vm3, %v1772_v42 }

</bundles_post_ra>
